<compile_context>
chip_gen: v7x
topology: tpu7x:2x2x1
jax: 0.10.0
libtpu: 0.0.40
codegen_flags: <defaults>
</compile_context>

<pallas_src>
import jax
import jax.numpy as jnp
from jax.experimental import pallas as pl
from jax.experimental.pallas import tpu as pltpu

IN_DIM = 784
HIDDEN = 500
OUT_DIM = 10

HIDDEN_P = 512   # 4 * 128 lanes
OUT_P = 128      # 1 * 128 lanes (lane-dense output store)


def _round_up(n, m):
    return ((n + m - 1) // m) * m


def _mlp_kernel(x_ref, w1_ref, b1_ref, w2_ref, b2_ref, o_ref):
    # Hot path: two MXU matmuls + bias adds + ReLU, fully fused per batch tile.
    x = x_ref[...]                                                     # (TB, 784)
    h = jnp.dot(x, w1_ref[...], preferred_element_type=jnp.float32)    # (TB, 512)
    h = jnp.maximum(h + b1_ref[...], 0.0)                              # bias + ReLU
    o = jnp.dot(h, w2_ref[...], preferred_element_type=jnp.float32)    # (TB, 128)
    o = o + b2_ref[...]
    o_ref[...] = o.astype(o_ref.dtype)


def pad_params(w1, b1, w2, b2):
    """Zero-pad params to lane-aligned shapes. Do this once at init, not per call."""
    w1p = jnp.pad(w1, ((0, 0), (0, HIDDEN_P - HIDDEN)))                # (784, 512)
    b1p = jnp.pad(b1, (0, HIDDEN_P - HIDDEN)).reshape(1, HIDDEN_P)     # (1, 512)
    w2p = jnp.pad(w2, ((0, HIDDEN_P - HIDDEN), (0, OUT_P - OUT_DIM)))  # (512, 128)
    b2p = jnp.pad(b2, (0, OUT_P - OUT_DIM)).reshape(1, OUT_P)          # (1, 128)
    return w1p, b1p, w2p, b2p


def net_forward(x, w1p, b1p, w2p, b2p, *, block_b=256):
    """x: (B, 784) f32 -> (B, 10) f32.

    Params must be the padded versions from pad_params(). Batch is tiled in blocks of
    `block_b` rows (default 256: mem-bound-friendly on v5e, pipelines activation DMA,
    and 2x double-buffered x tiles + h + weights stay well under v7x's 32 MiB scoped
    VMEM default).
    """
    B = x.shape[0]
    # Tile size: multiple of 8 sublanes, no larger than the (rounded-up) batch.
    tb = min(block_b, _round_up(B, 8))
    b_pad = _round_up(B, tb)
    if b_pad != B:
        x = jnp.pad(x, ((0, b_pad - B), (0, 0)))
    grid = (b_pad // tb,)

    out_padded = pl.pallas_call(
        _mlp_kernel,
        out_shape=jax.ShapeDtypeStruct((b_pad, OUT_P), jnp.float32),
        grid_spec=pltpu.PrefetchScalarGridSpec(
            num_scalar_prefetch=0,
            grid=grid,
            in_specs=[
                # Activations stream over the batch grid axis.
                pl.BlockSpec((tb, IN_DIM), lambda i: (i, 0)),
                # Weights / biases: same block every step -> resident in VMEM.
                pl.BlockSpec((IN_DIM, HIDDEN_P), lambda i: (0, 0)),
                pl.BlockSpec((1, HIDDEN_P), lambda i: (0, 0)),
                pl.BlockSpec((HIDDEN_P, OUT_P), lambda i: (0, 0)),
                pl.BlockSpec((1, OUT_P), lambda i: (0, 0)),
            ],
            out_specs=pl.BlockSpec((tb, OUT_P), lambda i: (i, 0)),
        ),
        compiler_params=pltpu.CompilerParams(
            # Batch tiles are independent -> shard across both TensorCores on v7x.
            dimension_semantics=("parallel",),
        ),
    )(x, w1p, b1p, w2p, b2p)

    return out_padded[:B, :OUT_DIM]


def init_params(key):
    """Deterministic init mimicking torch.nn.Linear default (U[-1/sqrt(fan_in), +])."""
    k1, k2, k3, k4 = jax.random.split(key, 4)
    bound1 = 1.0 / jnp.sqrt(jnp.float32(IN_DIM))
    bound2 = 1.0 / jnp.sqrt(jnp.float32(HIDDEN))
    w1 = jax.random.uniform(k1, (IN_DIM, HIDDEN), jnp.float32, -bound1, bound1)
    b1 = jax.random.uniform(k2, (HIDDEN,), jnp.float32, -bound1, bound1)
    w2 = jax.random.uniform(k3, (HIDDEN, OUT_DIM), jnp.float32, -bound2, bound2)
    b2 = jax.random.uniform(k4, (OUT_DIM,), jnp.float32, -bound2, bound2)
    return w1, b1, w2, b2


def _reference(x, w1, b1, w2, b2):
    return jnp.maximum(x @ w1 + b1, 0.0) @ w2 + b2


if __name__ == "__main__":
    key = jax.random.PRNGKey(0)
    kx, kx2, kp = jax.random.split(key, 3)

    w1, b1, w2, b2 = init_params(kp)
    w1p, b1p, w2p, b2p = pad_params(w1, b1, w2, b2)

    # Case 1: small batch (B=8), single tile.
    B = 8
    x = jax.random.normal(kx, (B, IN_DIM), jnp.float32)
    out = jax.block_until_ready(net_forward(x, w1p, b1p, w2p, b2p))
    ref = _reference(x, w1, b1, w2, b2)
    assert out.shape == (B, OUT_DIM)
    assert jnp.allclose(out, ref, atol=1e-4, rtol=1e-4)

    # Case 2: non-multiple batch with forced multi-tile grid (exercises batch tiling +
    # padding + resident-weight reuse across grid steps).
    B2 = 300
    x2 = jax.random.normal(kx2, (B2, IN_DIM), jnp.float32)
    out2 = jax.block_until_ready(net_forward(x2, w1p, b1p, w2p, b2p, block_b=128))
    ref2 = _reference(x2, w1, b1, w2, b2)
    assert out2.shape == (B2, OUT_DIM)
    assert jnp.allclose(out2, ref2, atol=1e-4, rtol=1e-4)

    print("KERNEL_OK")
</pallas_src>

<mosaic_0001>
module attributes {stable_mosaic.version = 11 : i64} {
  func.func @_mlp_kernel(%arg0: i32, %arg1: memref<8x784xf32, #tpu.memory_space<vmem>>, %arg2: memref<784x512xf32, #tpu.memory_space<vmem>>, %arg3: memref<1x512xf32, #tpu.memory_space<vmem>>, %arg4: memref<512x128xf32, #tpu.memory_space<vmem>>, %arg5: memref<1x128xf32, #tpu.memory_space<vmem>>, %arg6: memref<8x128xf32, #tpu.memory_space<vmem>>) attributes {dimension_semantics = [#tpu.dimension_semantics<parallel>], iteration_bounds = array<i64: 1>, scalar_prefetch = 0 : i64, scratch_operands = 0 : i64, tpu.core_type = #tpu.core_type<tc>, window_params = [{transform_indices = @transform_0, window_bounds = array<i64: 8, 784>}, {pipeline_mode = #tpu.pipeline_mode<synchronous>, transform_indices = @transform_1, window_bounds = array<i64: 784, 512>}, {pipeline_mode = #tpu.pipeline_mode<synchronous>, transform_indices = @transform_2, window_bounds = array<i64: 1, 512>}, {pipeline_mode = #tpu.pipeline_mode<synchronous>, transform_indices = @transform_3, window_bounds = array<i64: 512, 128>}, {pipeline_mode = #tpu.pipeline_mode<synchronous>, transform_indices = @transform_4, window_bounds = array<i64: 1, 128>}, {transform_indices = @transform_5, window_bounds = array<i64: 8, 128>}]} {
    %c0 = arith.constant 0 : index
    %c0_0 = arith.constant 0 : index
    %0 = vector.load %arg1[%c0, %c0_0] : memref<8x784xf32, #tpu.memory_space<vmem>>, vector<8x784xf32>
    %c0_1 = arith.constant 0 : index
    %c0_2 = arith.constant 0 : index
    %1 = vector.load %arg2[%c0_1, %c0_2] : memref<784x512xf32, #tpu.memory_space<vmem>>, vector<784x512xf32>
    %cst = arith.constant dense<0.000000e+00> : vector<8x512xf32>
    %2 = tpu.matmul %0, %1, %cst {dimension_numbers = #tpu.dot_dimension_numbers<[1], [0], [0], [1], [0, 0, 1, 1], [], []>} : vector<8x784xf32>, vector<784x512xf32>, vector<8x512xf32> -> vector<8x512xf32>
    %c0_3 = arith.constant 0 : index
    %c0_4 = arith.constant 0 : index
    %3 = vector.load %arg3[%c0_3, %c0_4] : memref<1x512xf32, #tpu.memory_space<vmem>>, vector<1x512xf32>
    %4 = vector.broadcast %3 : vector<1x512xf32> to vector<8x512xf32>
    %5 = arith.addf %2, %4 : vector<8x512xf32>
    %cst_5 = arith.constant 0.000000e+00 : f32
    %6 = vector.broadcast %cst_5 : f32 to vector<8x512xf32>
    %7 = arith.maximumf %5, %6 : vector<8x512xf32>
    %c0_6 = arith.constant 0 : index
    %c0_7 = arith.constant 0 : index
    %8 = vector.load %arg4[%c0_6, %c0_7] : memref<512x128xf32, #tpu.memory_space<vmem>>, vector<512x128xf32>
    %cst_8 = arith.constant dense<0.000000e+00> : vector<8x128xf32>
    %9 = tpu.matmul %7, %8, %cst_8 {dimension_numbers = #tpu.dot_dimension_numbers<[1], [0], [0], [1], [0, 0, 1, 1], [], []>} : vector<8x512xf32>, vector<512x128xf32>, vector<8x128xf32> -> vector<8x128xf32>
    %c0_9 = arith.constant 0 : index
    %c0_10 = arith.constant 0 : index
    %10 = vector.load %arg5[%c0_9, %c0_10] : memref<1x128xf32, #tpu.memory_space<vmem>>, vector<1x128xf32>
    %11 = vector.broadcast %10 : vector<1x128xf32> to vector<8x128xf32>
    %12 = arith.addf %9, %11 : vector<8x128xf32>
    %c0_11 = arith.constant 0 : index
    %c0_12 = arith.constant 0 : index
    %13 = vector.load %arg6[%c0_11, %c0_12] : memref<8x128xf32, #tpu.memory_space<vmem>>, vector<8x128xf32>
    tpu.vector_store %arg6[%c0_11, %c0_12], %12 {strides = array<i32>} : memref<8x128xf32, #tpu.memory_space<vmem>>, vector<8x128xf32>,
    return
  }
  func.func @transform_0(%arg0: i32) -> (i32, i32) {
    %c0_i32 = arith.constant 0 : i32
    %c0_i32_0 = arith.constant 0 : i32
    return %arg0, %c0_i32 : i32, i32
  }
  func.func @transform_1(%arg0: i32) -> (i32, i32) {
    %c0_i32 = arith.constant 0 : i32
    %c0_i32_0 = arith.constant 0 : i32
    %c0_i32_1 = arith.constant 0 : i32
    return %c0_i32, %c0_i32_0 : i32, i32
  }
  func.func @transform_2(%arg0: i32) -> (i32, i32) {
    %c0_i32 = arith.constant 0 : i32
    %c0_i32_0 = arith.constant 0 : i32
    %c0_i32_1 = arith.constant 0 : i32
    return %c0_i32, %c0_i32_0 : i32, i32
  }
  func.func @transform_3(%arg0: i32) -> (i32, i32) {
    %c0_i32 = arith.constant 0 : i32
    %c0_i32_0 = arith.constant 0 : i32
    %c0_i32_1 = arith.constant 0 : i32
    return %c0_i32, %c0_i32_0 : i32, i32
  }
  func.func @transform_4(%arg0: i32) -> (i32, i32) {
    %c0_i32 = arith.constant 0 : i32
    %c0_i32_0 = arith.constant 0 : i32
    %c0_i32_1 = arith.constant 0 : i32
    return %c0_i32, %c0_i32_0 : i32, i32
  }
  func.func @transform_5(%arg0: i32) -> (i32, i32) {
    %c0_i32 = arith.constant 0 : i32
    %c0_i32_0 = arith.constant 0 : i32
    return %arg0, %c0_i32 : i32, i32
  }
}

</mosaic_0001>

<bundles_post_ra>
// kernel: tpu_custom_call.1
= control target key start
LH: loop header
LB: loop body
LE: loop exit
PB: predicated region body
PF: predicated region fallthrough
CT: control target
= control target key end

     0   :  { %10 = vsyncpa [#allocation3], 0  ;;  %s2118_s0 = inlined_call_operand.hbm [shape: f32[8,784], index: 0, kind: input, shape index: {}]   ;;  %s2119_s1 = inlined_call_operand.hbm [shape: f32[784,512], index: 1, kind: input, shape index: {}]   ;;  %s2120_s2 = inlined_call_operand.hbm [shape: f32[1,512], index: 2, kind: input, shape index: {}]   ;;  %s2121_s3 = inlined_call_operand.hbm [shape: f32[512,128], index: 3, kind: input, shape index: {}]   ;;  %s2122_s4 = inlined_call_operand.hbm [shape: f32[1,128], index: 4, kind: input, shape index: {}]   ;;  %s2123_s5 = inlined_call_operand.hbm [shape: f32[8,128], index: 5, kind: output, shape index: {}]  }
   0x1   :  { %11 = vsyncpa [#allocation6], 0 }
   0x2   :  { %12 = vsyncpa [#allocation9], 0 }
   0x3   :  { %13 = vsyncpa [#allocation4], 0  ;;  %s2005_s18 = smov [#allocation5]   ;;  %s1865_s22 = scalar_lea.hbm %s2119_s1, 50176 }
   0x4   :  { %s29_s19 = sshll.u32 %s2005_s18, 4  ;;  %p1866_p0 = scmp.ne.s32.totalorder %s2119_s1, %s1865_s22  ;;  %s30_s19 = int_to_ptr.vmem [resolvable:$true] %s29_s19 }
   0x5   :  { %p1869_p1 = scmp.lt.u32.totalorder %s1865_s22, %s2119_s1 }
   0x7   :  { %p1871_p2 = pnand %p1869_p1, %p1866_p0 }
   0x9   :  { %1874 = shalt.err (!%p1871_p2)
}
   0xa   :  { %s1875_s27 = scalar_lea.vmem %s30_s19, 50176  ;;  %p1880_p4 = scmp.lt.s32.totalorder %s30_s19, %s30_s19 }
   0xb   :  { %p1876_p3 = scmp.ne.s32.totalorder %s30_s19, %s1875_s27  ;;  %p1881_p5 = scmp.lt.s32.totalorder %s1875_s27, %s1875_s27 }
   0xd   :  { %p1882_p6 = por %p1881_p5, %p1880_p4 }
   0xf   :  { %p1883_p7 = pnand %p1882_p6, %p1876_p3 }
  0x11   :  { %1886 = shalt.err (!%p1883_p7)
}
  0x12   :  { %s2006_s28 = smov 512   ;;  %s2007_s29 = smov 32  }
  0x13   :  { %35 = dma.hbm_to_vmem [thread:$0]  %s2119_s1, 50176, %s30_s19, [#allocation6], %s2006_s28, %s2006_s28, %s2007_s29  }
  0x14   :  { %s2008_s7 = smov [#allocation8]   ;;  %s1887_s11 = scalar_lea.hbm %s2121_s3, 8192 }
  0x15   :  { %s51_s8 = sshll.u32 %s2008_s7, 4  ;;  %p1888_p8 = scmp.ne.s32.totalorder %s2121_s3, %s1887_s11  ;;  %s52_s8 = int_to_ptr.vmem [resolvable:$true] %s51_s8 }
  0x16   :  { %p1891_p9 = scmp.lt.u32.totalorder %s1887_s11, %s2121_s3 }
  0x18   :  { %p1893_p10 = pnand %p1891_p9, %p1888_p8 }
  0x1a   :  { %1896 = shalt.err (!%p1893_p10)
}
  0x1b   :  { %s1897_s16 = scalar_lea.vmem %s52_s8, 8192  ;;  %p1902_p12 = scmp.lt.s32.totalorder %s52_s8, %s52_s8 }
  0x1c   :  { %p1898_p11 = scmp.ne.s32.totalorder %s52_s8, %s1897_s16  ;;  %p1903_p13 = scmp.lt.s32.totalorder %s1897_s16, %s1897_s16 }
  0x1e   :  { %p1904_p0 = por %p1903_p13, %p1902_p12 }
  0x20   :  { %p1905_p1 = pnand %p1904_p0, %p1898_p11 }
  0x22   :  { %1908 = shalt.err (!%p1905_p1)
}
  0x23   :  { %s2009_s1 = smov 128   ;;  %s2010_s17 = smov 8  }
  0x24   :  { %57 = dma.hbm_to_vmem [thread:$0]  %s2121_s3, 8192, %s52_s8, [#allocation9], %s2009_s1, %s2009_s1, %s2010_s17  }
  0x25   :  { %s2011_s20 = smov [#allocation2]   ;;  %s2012_s22 = smov [#allocation7]  }
  0x26   :  { %s20_s21 = sshll.u32 %s2011_s20, 4  ;;  %s42_s23 = sshll.u32 %s2012_s22, 4  ;;  %s21_s21 = int_to_ptr.vmem [resolvable:$true] %s20_s21  ;;  %s43_s23 = int_to_ptr.vmem [resolvable:$true] %s42_s23 }
  0x27   :  { %s1909_s26 = scalar_lea.hbm %s2118_s0, 896 }
  0x28   :  { %p1910_p2 = scmp.ne.s32.totalorder %s2118_s0, %s1909_s26  ;;  %p1913_p3 = scmp.lt.u32.totalorder %s1909_s26, %s2118_s0 }
  0x2a   :  { %p1915_p4 = pnand %p1913_p3, %p1910_p2 }
  0x2c   :  { %1918 = shalt.err (!%p1915_p4)
}
  0x2d   :  { %s1919_s3 = scalar_lea.vmem %s21_s21, 896  ;;  %p1924_p6 = scmp.lt.s32.totalorder %s21_s21, %s21_s21 }
  0x2e   :  { %p1920_p5 = scmp.ne.s32.totalorder %s21_s21, %s1919_s3  ;;  %p1925_p7 = scmp.lt.s32.totalorder %s1919_s3, %s1919_s3 }
  0x30   :  { %p1926_p8 = por %p1925_p7, %p1924_p6 }
  0x32   :  { %p1927_p9 = pnand %p1926_p8, %p1920_p5 }
  0x34   :  { %1930 = shalt.err (!%p1927_p9)
}
  0x35   :  { %23 = dma.hbm_to_vmem [thread:$0]  %s2118_s0, 896, %s21_s21, [#allocation3]  }
  0x36   :  { %s1931_s10 = scalar_lea.hbm %s2120_s2, 64 }
  0x37   :  { %p1932_p10 = scmp.ne.s32.totalorder %s2120_s2, %s1931_s10  ;;  %p1935_p11 = scmp.lt.u32.totalorder %s1931_s10, %s2120_s2 }
  0x39   :  { %p1937_p12 = pnand %p1935_p11, %p1932_p10 }
  0x3b   :  { %1940 = shalt.err (!%p1937_p12)
}
  0x3c   :  { %s1941_s15 = scalar_lea.vmem %s43_s23, 64  ;;  %p1946_p0 = scmp.lt.s32.totalorder %s43_s23, %s43_s23 }
  0x3d   :  { %p1942_p13 = scmp.ne.s32.totalorder %s43_s23, %s1941_s15  ;;  %p1947_p1 = scmp.lt.s32.totalorder %s1941_s15, %s1941_s15 }
  0x3f   :  { %p1948_p2 = por %p1947_p1, %p1946_p0 }
  0x41   :  { %p1949_p3 = pnand %p1948_p2, %p1942_p13 }
  0x43   :  { %1952 = shalt.err (!%p1949_p3)
}
  0x44   :  { %45 = dma.hbm_to_vmem [thread:$0]  %s2120_s2, 64, %s43_s23, [#allocation6]  }
  0x45   :  { %s2013_s1 = smov [#allocation10]   ;;  %s1953_s20 = scalar_lea.hbm %s2122_s4, 16 }
  0x46   :  { %s64_s17 = sshll.u32 %s2013_s1, 4  ;;  %p1954_p4 = scmp.ne.s32.totalorder %s2122_s4, %s1953_s20  ;;  %s65_s17 = int_to_ptr.vmem [resolvable:$true] %s64_s17 }
  0x47   :  { %p1957_p5 = scmp.lt.u32.totalorder %s1953_s20, %s2122_s4 }
  0x49   :  { %p1959_p6 = pnand %p1957_p5, %p1954_p4 }
  0x4b   :  { %1962 = shalt.err (!%p1959_p6)
}
  0x4c   :  { %s1963_s26 = scalar_lea.vmem %s65_s17, 16  ;;  %s1967_s2 = scalar_lea.vmem %s65_s17, 32 }
  0x4d   :  { %p1964_p7 = scmp.ne.s32.totalorder %s65_s17, %s1963_s26  ;;  %p1968_p8 = scmp.lt.s32.totalorder %s65_s17, %s65_s17 }
  0x4e   :  { %p1969_p9 = scmp.lt.s32.totalorder %s1967_s2, %s1963_s26 }
  0x50   :  { %p1970_p10 = por %p1969_p9, %p1968_p8 }
  0x52   :  { %p1971_p11 = pnand %p1970_p10, %p1964_p7 }
  0x54   :  { %1974 = shalt.err (!%p1971_p11)
}
  0x55   :  { %67 = dma.hbm_to_vmem [thread:$0]  %s2122_s4, 16, %s65_s17, [#allocation9]  }
  0x56   :  { %1997 = dma.done.wait [#allocation3], 896  }
  0x57   :  { %1998 = vsyncadd [#allocation3], 4294966400 }
  0x58   :  { %1999 = dma.done.wait [#allocation6], 50240  }
  0x59   :  { %2000 = vsyncadd [#allocation6], 4294917056 }
  0x5a   :  { %2001 = dma.done.wait [#allocation9], 8208  }
  0x5b   :  { %2002 = vsyncadd [#allocation9], 4294959088  ;;  %v91_v0 = vld [vmem:[#allocation5 + $0x8] sm:$0xff]  ;;  %v93_v2 = vld [vmem:[#allocation5 + $0x18] sm:$0xff]  ;;  %vm504_vm0 = vcmask 130048   ;;  %s2015_s4 = smov [#allocation11]  }
  0x5c   :  { %v95_v1 = vld [vmem:[#allocation5 + $0x28] sm:$0xff]  ;;  %v97_v4 = vld [vmem:[#allocation5 + $0x38] sm:$0xff]  ;;  %v90_v5 = vld [vmem:[#allocation5] sm:$0xff]  ;;  %s1298_s28 = sshll.u32 %s2015_s4, 4  ;;  %s1299_s28 = int_to_ptr.vmem [resolvable:$true] %s1298_s28 }
  0x5d   :  { %v1382_v3 = vpack.c.bf16 %v95_v1, %v91_v0  ;;  %v94_v6 = vld [vmem:[#allocation5 + $0x20] sm:$0xff]  ;;  %v1578_v7 = vpack.c.bf16 %v97_v4, %v93_v2  ;;  %v92_v9 = vld [vmem:[#allocation5 + $0x10] sm:$0xff]  ;;  %v99_v11 = vld [vmem:[#allocation5 + $0x48] sm:$0xff]  ;;  %s1975_s29 = scalar_lea.vmem %s1299_s28, 128  ;;  %p1980_p13 = scmp.lt.s32.totalorder %s1299_s28, %s1299_s28 }
  0x5e   :  { %v1384_v8 = vpack.c.bf16 %v94_v6, %v90_v5  ;;  %v96_v10 = vld [vmem:[#allocation5 + $0x30] sm:$0xff]  ;;  %v103_v13 = vld [vmem:[#allocation5 + $0x68] sm:$0xff]  ;;  %v101_v14 = vld [vmem:[#allocation5 + $0x58] sm:$0xff]  ;;  %p1976_p12 = scmp.ne.s32.totalorder %s1299_s28, %s1975_s29  ;;  %p1981_p0 = scmp.lt.s32.totalorder %s1975_s29, %s1975_s29 }
  0x5f   :  { %1383 = vmatprep.subr.bf16.mxu0 %v1382_v3  ;;  %v1580_v12 = vpack.c.bf16 %v96_v10, %v92_v9  ;;  %v105_v15 = vld [vmem:[#allocation5 + $0x78] sm:$0xff]  ;;  %1579 = vmatprep.subr.bf16.mxu1 %v1578_v7  ;;  %v1386_v16 = vpack.c.bf16 %v103_v13, %v99_v11  ;;  %v98_v18 = vld [vmem:[#allocation5 + $0x40] sm:$0xff]  ;;  %v100_v20 = vld [vmem:[#allocation5 + $0x50] sm:$0xff] }
  0x60   :  { %1385 = vmatpush1.bf16.msra.mxu0 %v1384_v8  ;;  %v1582_v17 = vpack.c.bf16 %v105_v15, %v101_v14  ;;  %v102_v19 = vld [vmem:[#allocation5 + $0x60] sm:$0xff]  ;;  %v104_v22 = vld [vmem:[#allocation5 + $0x70] sm:$0xff]  ;;  %v107_v23 = vld [vmem:[#allocation5 + $0x88] sm:$0xff]  ;;  %p1982_p1 = por %p1981_p0, %p1980_p13 }
  0x61   :  { %1581 = vmatpush1.bf16.msra.mxu1 %v1580_v12  ;;  %v1388_v21 = vpack.c.bf16 %v102_v19, %v98_v18  ;;  %v111_v24 = vld [vmem:[#allocation5 + $0xa8] sm:$0xff]  ;;  %1387 = vmatprep.subr.bf16.mxu0 %v1386_v16  ;;  %v1584_v25 = vpack.c.bf16 %v104_v22, %v100_v20  ;;  %v109_v27 = vld [vmem:[#allocation5 + $0x98] sm:$0xff]  ;;  %v106_v29 = vld [vmem:[#allocation5 + $0x80] sm:$0xff] }
  0x62   :  { %1583 = vmatprep.subr.bf16.mxu1 %v1582_v17  ;;  %v1390_v26 = vpack.c.bf16 %v111_v24, %v107_v23  ;;  %v113_v28 = vld [vmem:[#allocation5 + $0xb8] sm:$0xff]  ;;  %v110_v31 = vld [vmem:[#allocation5 + $0xa0] sm:$0xff]  ;;  %v108_v32 = vld [vmem:[#allocation5 + $0x90] sm:$0xff]  ;;  %p1983_p2 = pnand %p1982_p1, %p1976_p12 }
  0x63   :  { %v1586_v30 = vpack.c.bf16 %v113_v28, %v109_v27  ;;  %v112_v33 = vld [vmem:[#allocation5 + $0xb0] sm:$0xff]  ;;  %v1392_v34 = vpack.c.bf16 %v110_v31, %v106_v29  ;;  %v115_v35 = vld [vmem:[#allocation5 + $0xc8] sm:$0xff]  ;;  %v117_v37 = vld [vmem:[#allocation5 + $0xd8] sm:$0xff] }
  0x64   :  { %1389 = vmatpush1.bf16.msra.mxu0 %v1388_v21  ;;  %v119_v36 = vld [vmem:[#allocation5 + $0xe8] sm:$0xff]  ;;  %v1588_v38 = vpack.c.bf16 %v112_v33, %v108_v32  ;;  %v121_v40 = vld [vmem:[#allocation5 + $0xf8] sm:$0xff]  ;;  %v114_v41 = vld [vmem:[#allocation5 + $0xc0] sm:$0xff] }
  0x65   :  { %1585 = vmatpush1.bf16.msra.mxu1 %v1584_v25  ;;  %1391 = vmatprep.subr.bf16.mxu0 %v1390_v26  ;;  %v1394_v39 = vpack.c.bf16 %v119_v36, %v115_v35  ;;  %v118_v42 = vld [vmem:[#allocation5 + $0xe0] sm:$0xff]  ;;  %v1590_v43 = vpack.c.bf16 %v121_v40, %v117_v37  ;;  %v116_v44 = vld [vmem:[#allocation5 + $0xd0] sm:$0xff]  ;;  %v123_v46 = vld [vmem:[#allocation5 + $0x108] sm:$0xff] }
  0x66   :  { %1587 = vmatprep.subr.bf16.mxu1 %v1586_v30  ;;  %v120_v45 = vld [vmem:[#allocation5 + $0xf0] sm:$0xff]  ;;  %v127_v47 = vld [vmem:[#allocation5 + $0x128] sm:$0xff]  ;;  %v125_v48 = vld [vmem:[#allocation5 + $0x118] sm:$0xff]  ;;  %v1396_v50 = vpack.c.bf16 %v118_v42, %v114_v41 }
  0x67   :  { %v129_v49 = vld [vmem:[#allocation5 + $0x138] sm:$0xff]  ;;  %v1592_v51 = vpack.c.bf16 %v120_v45, %v116_v44  ;;  %v1398_v52 = vpack.c.bf16 %v127_v47, %v123_v46  ;;  %v122_v53 = vld [vmem:[#allocation5 + $0x100] sm:$0xff]  ;;  %v124_v55 = vld [vmem:[#allocation5 + $0x110] sm:$0xff] }
  0x68   :  { %1393 = vmatpush1.bf16.msra.mxu0 %v1392_v34  ;;  %v126_v54 = vld [vmem:[#allocation5 + $0x120] sm:$0xff]  ;;  %v1594_v56 = vpack.c.bf16 %v129_v49, %v125_v48  ;;  %v128_v57 = vld [vmem:[#allocation5 + $0x130] sm:$0xff]  ;;  %v131_v58 = vld [vmem:[#allocation5 + $0x148] sm:$0xff] }
  0x69   :  { %1589 = vmatpush1.bf16.msra.mxu1 %v1588_v38  ;;  %1395 = vmatprep.subr.bf16.mxu0 %v1394_v39  ;;  %v135_v59 = vld [vmem:[#allocation5 + $0x168] sm:$0xff]  ;;  %v133_v60 = vld [vmem:[#allocation5 + $0x158] sm:$0xff]  ;;  %v1400_v62 = vpack.c.bf16 %v126_v54, %v122_v53  ;;  %v1596_v63 = vpack.c.bf16 %v128_v57, %v124_v55  ;;  %v130_v1 = vld [vmem:[#allocation5 + $0x140] sm:$0xff] }
  0x6a   :  { %1591 = vmatprep.subr.bf16.mxu1 %v1590_v43  ;;  %v137_v61 = vld [vmem:[#allocation5 + $0x178] sm:$0xff]  ;;  %v1402_v0 = vpack.c.bf16 %v135_v59, %v131_v58  ;;  %v134_v2 = vld [vmem:[#allocation5 + $0x160] sm:$0xff]  ;;  %v132_v3 = vld [vmem:[#allocation5 + $0x150] sm:$0xff] }
  0x6b   :  { %v1598_v4 = vpack.c.bf16 %v137_v61, %v133_v60  ;;  %v136_v5 = vld [vmem:[#allocation5 + $0x170] sm:$0xff]  ;;  %v139_v6 = vld [vmem:[#allocation5 + $0x188] sm:$0xff]  ;;  %v141_v8 = vld [vmem:[#allocation5 + $0x198] sm:$0xff]  ;;  %v1404_v10 = vpack.c.bf16 %v134_v2, %v130_v1 }
  0x6c   :  { %1397 = vmatpush1.bf16.msra.mxu0 %v1396_v50  ;;  %v143_v7 = vld [vmem:[#allocation5 + $0x1a8] sm:$0xff]  ;;  %v145_v9 = vld [vmem:[#allocation5 + $0x1b8] sm:$0xff]  ;;  %v1600_v11 = vpack.c.bf16 %v136_v5, %v132_v3  ;;  %v138_v13 = vld [vmem:[#allocation5 + $0x180] sm:$0xff] }
  0x6d   :  { %1593 = vmatpush1.bf16.msra.mxu1 %v1592_v51  ;;  %1399 = vmatprep.subr.bf16.mxu0 %v1398_v52  ;;  %v1406_v12 = vpack.c.bf16 %v143_v7, %v139_v6  ;;  %v142_v14 = vld [vmem:[#allocation5 + $0x1a0] sm:$0xff]  ;;  %v140_v15 = vld [vmem:[#allocation5 + $0x190] sm:$0xff]  ;;  %v1602_v16 = vpack.c.bf16 %v145_v9, %v141_v8  ;;  %v147_v18 = vld [vmem:[#allocation5 + $0x1c8] sm:$0xff] }
  0x6e   :  { %1595 = vmatprep.subr.bf16.mxu1 %v1594_v56  ;;  %v144_v17 = vld [vmem:[#allocation5 + $0x1b0] sm:$0xff]  ;;  %v151_v19 = vld [vmem:[#allocation5 + $0x1e8] sm:$0xff]  ;;  %v149_v20 = vld [vmem:[#allocation5 + $0x1d8] sm:$0xff]  ;;  %v1408_v22 = vpack.c.bf16 %v142_v14, %v138_v13 }
  0x6f   :  { %v153_v21 = vld [vmem:[#allocation5 + $0x1f8] sm:$0xff]  ;;  %v1604_v23 = vpack.c.bf16 %v144_v17, %v140_v15  ;;  %v1410_v24 = vpack.c.bf16 %v151_v19, %v147_v18  ;;  %v146_v25 = vld [vmem:[#allocation5 + $0x1c0] sm:$0xff]  ;;  %v148_v27 = vld [vmem:[#allocation5 + $0x1d0] sm:$0xff] }
  0x70   :  { %1401 = vmatpush1.bf16.msra.mxu0 %v1400_v62  ;;  %v150_v26 = vld [vmem:[#allocation5 + $0x1e0] sm:$0xff]  ;;  %v1606_v28 = vpack.c.bf16 %v153_v21, %v149_v20  ;;  %v152_v29 = vld [vmem:[#allocation5 + $0x1f0] sm:$0xff]  ;;  %v155_v30 = vld [vmem:[#allocation5 + $0x208] sm:$0xff] }
  0x71   :  { %1597 = vmatpush1.bf16.msra.mxu1 %v1596_v63  ;;  %1403 = vmatprep.subr.bf16.mxu0 %v1402_v0  ;;  %v159_v31 = vld [vmem:[#allocation5 + $0x228] sm:$0xff]  ;;  %v157_v32 = vld [vmem:[#allocation5 + $0x218] sm:$0xff]  ;;  %v1412_v34 = vpack.c.bf16 %v150_v26, %v146_v25  ;;  %v1608_v35 = vpack.c.bf16 %v152_v29, %v148_v27  ;;  %v154_v37 = vld [vmem:[#allocation5 + $0x200] sm:$0xff] }
  0x72   :  { %1599 = vmatprep.subr.bf16.mxu1 %v1598_v4  ;;  %v161_v33 = vld [vmem:[#allocation5 + $0x238] sm:$0xff]  ;;  %v1414_v36 = vpack.c.bf16 %v159_v31, %v155_v30  ;;  %v158_v38 = vld [vmem:[#allocation5 + $0x220] sm:$0xff]  ;;  %v156_v39 = vld [vmem:[#allocation5 + $0x210] sm:$0xff] }
  0x73   :  { %v1610_v40 = vpack.c.bf16 %v161_v33, %v157_v32  ;;  %v160_v41 = vld [vmem:[#allocation5 + $0x230] sm:$0xff]  ;;  %v163_v42 = vld [vmem:[#allocation5 + $0x248] sm:$0xff]  ;;  %v165_v44 = vld [vmem:[#allocation5 + $0x258] sm:$0xff]  ;;  %v1416_v46 = vpack.c.bf16 %v158_v38, %v154_v37 }
  0x74   :  { %1405 = vmatpush1.bf16.msra.mxu0 %v1404_v10  ;;  %v167_v43 = vld [vmem:[#allocation5 + $0x268] sm:$0xff]  ;;  %v169_v45 = vld [vmem:[#allocation5 + $0x278] sm:$0xff]  ;;  %v1612_v47 = vpack.c.bf16 %v160_v41, %v156_v39  ;;  %v162_v49 = vld [vmem:[#allocation5 + $0x240] sm:$0xff] }
  0x75   :  { %1601 = vmatpush1.bf16.msra.mxu1 %v1600_v11  ;;  %1407 = vmatprep.subr.bf16.mxu0 %v1406_v12  ;;  %v1418_v48 = vpack.c.bf16 %v167_v43, %v163_v42  ;;  %v166_v50 = vld [vmem:[#allocation5 + $0x260] sm:$0xff]  ;;  %v164_v51 = vld [vmem:[#allocation5 + $0x250] sm:$0xff]  ;;  %v1614_v52 = vpack.c.bf16 %v169_v45, %v165_v44  ;;  %v171_v54 = vld [vmem:[#allocation5 + $0x288] sm:$0xff] }
  0x76   :  { %1603 = vmatprep.subr.bf16.mxu1 %v1602_v16  ;;  %v168_v53 = vld [vmem:[#allocation5 + $0x270] sm:$0xff]  ;;  %v175_v55 = vld [vmem:[#allocation5 + $0x2a8] sm:$0xff]  ;;  %v173_v56 = vld [vmem:[#allocation5 + $0x298] sm:$0xff]  ;;  %v1420_v58 = vpack.c.bf16 %v166_v50, %v162_v49 }
  0x77   :  { %v177_v57 = vld [vmem:[#allocation5 + $0x2b8] sm:$0xff]  ;;  %v1616_v59 = vpack.c.bf16 %v168_v53, %v164_v51  ;;  %v1422_v60 = vpack.c.bf16 %v175_v55, %v171_v54  ;;  %v170_v61 = vld [vmem:[#allocation5 + $0x280] sm:$0xff]  ;;  %v172_v63 = vld [vmem:[#allocation5 + $0x290] sm:$0xff] }
  0x78   :  { %1409 = vmatpush1.bf16.msra.mxu0 %v1408_v22  ;;  %v174_v62 = vld [vmem:[#allocation5 + $0x2a0] sm:$0xff]  ;;  %v1618_v0 = vpack.c.bf16 %v177_v57, %v173_v56  ;;  %v176_v1 = vld [vmem:[#allocation5 + $0x2b0] sm:$0xff]  ;;  %v179_v2 = vld [vmem:[#allocation5 + $0x2c8] sm:$0xff] }
  0x79   :  { %1605 = vmatpush1.bf16.msra.mxu1 %v1604_v23  ;;  %1411 = vmatprep.subr.bf16.mxu0 %v1410_v24  ;;  %v183_v3 = vld [vmem:[#allocation5 + $0x2e8] sm:$0xff]  ;;  %v181_v4 = vld [vmem:[#allocation5 + $0x2d8] sm:$0xff]  ;;  %v1424_v6 = vpack.c.bf16 %v174_v62, %v170_v61  ;;  %v178_v7 = vld [vmem:[#allocation5 + $0x2c0] sm:$0xff]  ;;  %v1620_v8 = vpack.c.bf16 %v176_v1, %v172_v63 }
  0x7a   :  { %1607 = vmatprep.subr.bf16.mxu1 %v1606_v28  ;;  %v185_v5 = vld [vmem:[#allocation5 + $0x2f8] sm:$0xff]  ;;  %v1426_v9 = vpack.c.bf16 %v183_v3, %v179_v2  ;;  %v182_v10 = vld [vmem:[#allocation5 + $0x2e0] sm:$0xff]  ;;  %v180_v11 = vld [vmem:[#allocation5 + $0x2d0] sm:$0xff] }
  0x7b   :  { %v184_v12 = vld [vmem:[#allocation5 + $0x2f0] sm:$0xff]  ;;  %v1622_v13 = vpack.c.bf16 %v185_v5, %v181_v4  ;;  %v187_v14 = vld [vmem:[#allocation5 + $0x308] sm:$0xff]  ;;  %v189_v17 = vld [vmem:[#allocation5 + $0x318] sm:$0xff]  ;;  %v1428_v19 = vpack.c.bf16 %v182_v10, %v178_v7 }
  0x7c   :  { %1413 = vmatpush1.bf16.msra.mxu0 %v1412_v34  ;;  %v191_v15 = vld [vmem:[#allocation5 + $0x328] sm:$0xff]  ;;  %v84_v16 = vld [vmem:[#allocation2 + $0x8] sm:$0xff]  ;;  %v193_v18 = vld [vmem:[#allocation5 + $0x338] sm:$0xff]  ;;  %v1624_v20 = vpack.c.bf16 %v184_v12, %v180_v11 }
  0x7d   :  { %1609 = vmatpush1.bf16.msra.mxu1 %v1608_v35  ;;  %1415 = vmatprep.subr.bf16.mxu0 %v1414_v36  ;;  %v1430_v21 = vpack.c.bf16 %v191_v15, %v187_v14  ;;  %v186_v22 = vld [vmem:[#allocation5 + $0x300] sm:$0xff]  ;;  %v188_v24 = vld [vmem:[#allocation5 + $0x310] sm:$0xff]  ;;  %v1626_v25 = vpack.c.bf16 %v193_v18, %v189_v17  ;;  %v195_v27 = vld [vmem:[#allocation5 + $0x348] sm:$0xff] }
  0x7e   :  { %1611 = vmatprep.subr.bf16.mxu1 %v1610_v40  ;;  %572 = vmatprep.mubr.f32.mxu0 %v84_v16  ;;  %v190_v23 = vld [vmem:[#allocation5 + $0x320] sm:$0xff]  ;;  %v192_v26 = vld [vmem:[#allocation5 + $0x330] sm:$0xff]  ;;  %v199_v28 = vld [vmem:[#allocation5 + $0x368] sm:$0xff] }
  0x7f   :  { %856 = vmatprep.mubr.f32.mxu1 %v84_v16  ;;  %v197_v29 = vld [vmem:[#allocation5 + $0x358] sm:$0xff]  ;;  %v1432_v31 = vpack.c.bf16 %v190_v23, %v186_v22  ;;  %v1628_v32 = vpack.c.bf16 %v192_v26, %v188_v24  ;;  %v1434_v33 = vpack.c.bf16 %v199_v28, %v195_v27  ;;  %v194_v34 = vld [vmem:[#allocation5 + $0x340] sm:$0xff]  ;;  %v196_v36 = vld [vmem:[#allocation5 + $0x350] sm:$0xff] }
  0x80   :  { %1417 = vmatpush1.bf16.msra.mxu0 %v1416_v46  ;;  %v201_v30 = vld [vmem:[#allocation5 + $0x378] sm:$0xff]  ;;  %v198_v35 = vld [vmem:[#allocation5 + $0x360] sm:$0xff]  ;;  %v200_v38 = vld [vmem:[#allocation5 + $0x370] sm:$0xff] }
  0x81   :  { %1613 = vmatpush1.bf16.msra.mxu1 %v1612_v47  ;;  %1419 = vmatprep.subr.bf16.mxu0 %v1418_v48  ;;  %v1630_v37 = vpack.c.bf16 %v201_v30, %v197_v29  ;;  %v203_v39 = vld [vmem:[#allocation5 + $0x388] sm:$0xff]  ;;  %v205_v41 = vld [vmem:[#allocation5 + $0x398] sm:$0xff]  ;;  %v1436_v43 = vpack.c.bf16 %v198_v35, %v194_v34  ;;  %v1632_v44 = vpack.c.bf16 %v200_v38, %v196_v36  ;;  %v202_v46 = vld [vmem:[#allocation5 + $0x380] sm:$0xff] }
  0x82   :  { %1615 = vmatprep.subr.bf16.mxu1 %v1614_v52  ;;  %v207_v40 = vld [vmem:[#allocation5 + $0x3a8] sm:$0xff]  ;;  %v209_v42 = vld [vmem:[#allocation5 + $0x3b8] sm:$0xff]  ;;  %v206_v47 = vld [vmem:[#allocation5 + $0x3a0] sm:$0xff] }
  0x83   :  { %v1438_v45 = vpack.c.bf16 %v207_v40, %v203_v39  ;;  %v204_v48 = vld [vmem:[#allocation5 + $0x390] sm:$0xff]  ;;  %v1634_v49 = vpack.c.bf16 %v209_v42, %v205_v41  ;;  %v211_v51 = vld [vmem:[#allocation5 + $0x3c8] sm:$0xff]  ;;  %v213_v53 = vld [vmem:[#allocation5 + $0x3d8] sm:$0xff]  ;;  %v1440_v55 = vpack.c.bf16 %v206_v47, %v202_v46 }
  0x84   :  { %1421 = vmatpush1.bf16.msra.mxu0 %v1420_v58  ;;  %v208_v50 = vld [vmem:[#allocation5 + $0x3b0] sm:$0xff]  ;;  %v215_v52 = vld [vmem:[#allocation5 + $0x3e8] sm:$0xff]  ;;  %v217_v54 = vld [vmem:[#allocation5 + $0x3f8] sm:$0xff] }
  0x85   :  { %1617 = vmatpush1.bf16.msra.mxu1 %v1616_v59  ;;  %1423 = vmatprep.subr.bf16.mxu0 %v1422_v60  ;;  %v1636_v56 = vpack.c.bf16 %v208_v50, %v204_v48  ;;  %v1442_v57 = vpack.c.bf16 %v215_v52, %v211_v51  ;;  %v210_v58 = vld [vmem:[#allocation5 + $0x3c0] sm:$0xff]  ;;  %v212_v60 = vld [vmem:[#allocation5 + $0x3d0] sm:$0xff]  ;;  %v1638_v61 = vpack.c.bf16 %v217_v54, %v213_v53  ;;  %v219_v63 = vld [vmem:[#allocation5 + $0x408] sm:$0xff] }
  0x86   :  { %1619 = vmatprep.subr.bf16.mxu1 %v1618_v0  ;;  %v214_v59 = vld [vmem:[#allocation5 + $0x3e0] sm:$0xff]  ;;  %v216_v62 = vld [vmem:[#allocation5 + $0x3f0] sm:$0xff]  ;;  %v223_v0 = vld [vmem:[#allocation5 + $0x428] sm:$0xff] }
  0x87   :  { %v221_v1 = vld [vmem:[#allocation5 + $0x418] sm:$0xff]  ;;  %v1444_v3 = vpack.c.bf16 %v214_v59, %v210_v58  ;;  %v1640_v4 = vpack.c.bf16 %v216_v62, %v212_v60  ;;  %v1446_v5 = vpack.c.bf16 %v223_v0, %v219_v63  ;;  %v222_v7 = vld [vmem:[#allocation5 + $0x420] sm:$0xff]  ;;  %v224_v10 = vld [vmem:[#allocation5 + $0x430] sm:$0xff] }
  0x88   :  { %1425 = vmatpush1.bf16.msra.mxu0 %v1424_v6  ;;  %v225_v2 = vld [vmem:[#allocation5 + $0x438] sm:$0xff]  ;;  %v218_v6 = vld [vmem:[#allocation5 + $0x400] sm:$0xff]  ;;  %v227_v11 = vld [vmem:[#allocation5 + $0x448] sm:$0xff] }
  0x89   :  { %1621 = vmatpush1.bf16.msra.mxu1 %v1620_v8  ;;  %1427 = vmatprep.subr.bf16.mxu0 %v1426_v9  ;;  %v220_v8 = vld [vmem:[#allocation5 + $0x410] sm:$0xff]  ;;  %v1642_v9 = vpack.c.bf16 %v225_v2, %v221_v1  ;;  %v231_v12 = vld [vmem:[#allocation5 + $0x468] sm:$0xff]  ;;  %v233_v14 = vld [vmem:[#allocation5 + $0x478] sm:$0xff]  ;;  %v1448_v16 = vpack.c.bf16 %v222_v7, %v218_v6 }
  0x8a   :  { %1623 = vmatprep.subr.bf16.mxu1 %v1622_v13  ;;  %v229_v13 = vld [vmem:[#allocation5 + $0x458] sm:$0xff]  ;;  %v83_v15 = vld [vmem:[#allocation2] sm:$0xff]  ;;  %v1644_v17 = vpack.c.bf16 %v224_v10, %v220_v8  ;;  %v1450_v18 = vpack.c.bf16 %v231_v12, %v227_v11  ;;  %v232_v23 = vld [vmem:[#allocation5 + $0x470] sm:$0xff] }
  0x8b   :  { %v1646_v22 = vpack.c.bf16 %v233_v14, %v229_v13  ;;  %v235_v24 = vld [vmem:[#allocation5 + $0x488] sm:$0xff]  ;;  %v237_v26 = vld [vmem:[#allocation5 + $0x498] sm:$0xff]  ;;  %v240_v35 = vld [vmem:[#allocation5 + $0x4b0] sm:$0xff] }
  0x8c   :  { %1429 = vmatpush1.bf16.msra.mxu0 %v1428_v19  ;;  %v226_v19 = vld [vmem:[#allocation5 + $0x440] sm:$0xff]  ;;  %v241_v27 = vld [vmem:[#allocation5 + $0x4b8] sm:$0xff]  ;;  %v243_v36 = vld [vmem:[#allocation5 + $0x4c8] sm:$0xff] }
  0x8d   :  { %1625 = vmatpush1.bf16.msra.mxu1 %v1624_v20  ;;  %1431 = vmatprep.subr.bf16.mxu0 %v1430_v21  ;;  %v230_v20 = vld [vmem:[#allocation5 + $0x460] sm:$0xff]  ;;  %v228_v21 = vld [vmem:[#allocation5 + $0x450] sm:$0xff]  ;;  %v1650_v34 = vpack.c.bf16 %v241_v27, %v237_v26  ;;  %v245_v38 = vld [vmem:[#allocation5 + $0x4d8] sm:$0xff] }
  0x8e   :  { %1627 = vmatprep.subr.bf16.mxu1 %v1626_v25  ;;  %v239_v25 = vld [vmem:[#allocation5 + $0x4a8] sm:$0xff]  ;;  %v1452_v28 = vpack.c.bf16 %v230_v20, %v226_v19  ;;  %v1648_v29 = vpack.c.bf16 %v232_v23, %v228_v21  ;;  %v249_v39 = vld [vmem:[#allocation5 + $0x4f8] sm:$0xff]  ;;  %v248_v47 = vld [vmem:[#allocation5 + $0x4f0] sm:$0xff] }
  0x8f   :  { %v1454_v30 = vpack.c.bf16 %v239_v25, %v235_v24  ;;  %v1654_v46 = vpack.c.bf16 %v249_v39, %v245_v38  ;;  %v251_v48 = vld [vmem:[#allocation5 + $0x508] sm:$0xff]  ;;  %v253_v50 = vld [vmem:[#allocation5 + $0x518] sm:$0xff]  ;;  %v256_v59 = vld [vmem:[#allocation5 + $0x530] sm:$0xff] }
  0x90   :  { %1433 = vmatpush1.bf16.msra.mxu0 %v1432_v31  ;;  %v234_v31 = vld [vmem:[#allocation5 + $0x480] sm:$0xff]  ;;  %v257_v51 = vld [vmem:[#allocation5 + $0x538] sm:$0xff]  ;;  %v259_v60 = vld [vmem:[#allocation5 + $0x548] sm:$0xff] }
  0x91   :  { %1629 = vmatpush1.bf16.msra.mxu1 %v1628_v32  ;;  %1435 = vmatprep.subr.bf16.mxu0 %v1434_v33  ;;  %v238_v32 = vld [vmem:[#allocation5 + $0x4a0] sm:$0xff]  ;;  %v236_v33 = vld [vmem:[#allocation5 + $0x490] sm:$0xff]  ;;  %v1658_v58 = vpack.c.bf16 %v257_v51, %v253_v50  ;;  %v261_v62 = vld [vmem:[#allocation5 + $0x558] sm:$0xff] }
  0x92   :  { %1631 = vmatprep.subr.bf16.mxu1 %v1630_v37  ;;  %v247_v37 = vld [vmem:[#allocation5 + $0x4e8] sm:$0xff]  ;;  %v1456_v40 = vpack.c.bf16 %v238_v32, %v234_v31  ;;  %v1652_v41 = vpack.c.bf16 %v240_v35, %v236_v33  ;;  %v265_v63 = vld [vmem:[#allocation5 + $0x578] sm:$0xff]  ;;  %v264_v7 = vld [vmem:[#allocation5 + $0x570] sm:$0xff] }
  0x93   :  { %v1458_v42 = vpack.c.bf16 %v247_v37, %v243_v36  ;;  %v1662_v6 = vpack.c.bf16 %v265_v63, %v261_v62  ;;  %v267_v8 = vld [vmem:[#allocation5 + $0x588] sm:$0xff]  ;;  %v269_v10 = vld [vmem:[#allocation5 + $0x598] sm:$0xff]  ;;  %v266_v13 = vld [vmem:[#allocation5 + $0x580] sm:$0xff] }
  0x94   :  { %1437 = vmatpush1.bf16.msra.mxu0 %v1436_v43  ;;  %v242_v43 = vld [vmem:[#allocation5 + $0x4c0] sm:$0xff]  ;;  %v273_v11 = vld [vmem:[#allocation5 + $0x5b8] sm:$0xff]  ;;  %v275_v20 = vld [vmem:[#allocation5 + $0x5c8] sm:$0xff] }
  0x95   :  { %1633 = vmatpush1.bf16.msra.mxu1 %v1632_v44  ;;  %1439 = vmatprep.subr.bf16.mxu0 %v1438_v45  ;;  %v246_v44 = vld [vmem:[#allocation5 + $0x4e0] sm:$0xff]  ;;  %v244_v45 = vld [vmem:[#allocation5 + $0x4d0] sm:$0xff]  ;;  %v1666_v19 = vpack.c.bf16 %v273_v11, %v269_v10  ;;  %v279_v21 = vld [vmem:[#allocation5 + $0x5e8] sm:$0xff] }
  0x96   :  { %1635 = vmatprep.subr.bf16.mxu1 %v1634_v49  ;;  %v255_v49 = vld [vmem:[#allocation5 + $0x528] sm:$0xff]  ;;  %v1460_v52 = vpack.c.bf16 %v246_v44, %v242_v43  ;;  %v1656_v53 = vpack.c.bf16 %v248_v47, %v244_v45  ;;  %v277_v23 = vld [vmem:[#allocation5 + $0x5d8] sm:$0xff]  ;;  %v1474_v27 = vpack.c.bf16 %v279_v21, %v275_v20  ;;  %v280_v32 = vld [vmem:[#allocation5 + $0x5f0] sm:$0xff] }
  0x97   :  { %v1462_v54 = vpack.c.bf16 %v255_v49, %v251_v48  ;;  %v281_v24 = vld [vmem:[#allocation5 + $0x5f8] sm:$0xff]  ;;  %v283_v33 = vld [vmem:[#allocation5 + $0x608] sm:$0xff]  ;;  %v288_v44 = vld [vmem:[#allocation5 + $0x630] sm:$0xff] }
  0x98   :  { %1441 = vmatpush1.bf16.msra.mxu0 %v1440_v55  ;;  %v250_v55 = vld [vmem:[#allocation5 + $0x500] sm:$0xff]  ;;  %v1670_v31 = vpack.c.bf16 %v281_v24, %v277_v23  ;;  %v285_v35 = vld [vmem:[#allocation5 + $0x618] sm:$0xff]  ;;  %v291_v45 = vld [vmem:[#allocation5 + $0x648] sm:$0xff] }
  0x99   :  { %1637 = vmatpush1.bf16.msra.mxu1 %v1636_v56  ;;  %1443 = vmatprep.subr.bf16.mxu0 %v1442_v57  ;;  %v254_v56 = vld [vmem:[#allocation5 + $0x520] sm:$0xff]  ;;  %v252_v57 = vld [vmem:[#allocation5 + $0x510] sm:$0xff]  ;;  %v289_v36 = vld [vmem:[#allocation5 + $0x638] sm:$0xff] }
  0x9a   :  { %1639 = vmatprep.subr.bf16.mxu1 %v1638_v61  ;;  %v263_v61 = vld [vmem:[#allocation5 + $0x568] sm:$0xff]  ;;  %v1464_v0 = vpack.c.bf16 %v254_v56, %v250_v55  ;;  %v1660_v1 = vpack.c.bf16 %v256_v59, %v252_v57  ;;  %v1674_v43 = vpack.c.bf16 %v289_v36, %v285_v35  ;;  %v293_v47 = vld [vmem:[#allocation5 + $0x658] sm:$0xff]  ;;  %v296_v56 = vld [vmem:[#allocation5 + $0x670] sm:$0xff] }
  0x9b   :  { %v1466_v2 = vpack.c.bf16 %v263_v61, %v259_v60  ;;  %v297_v48 = vld [vmem:[#allocation5 + $0x678] sm:$0xff]  ;;  %v299_v57 = vld [vmem:[#allocation5 + $0x688] sm:$0xff]  ;;  %v314_v24 = vld [vmem:[#allocation5 + $0x700] sm:$0xff] }
  0x9c   :  { %1445 = vmatpush1.bf16.msra.mxu0 %v1444_v3  ;;  %v258_v3 = vld [vmem:[#allocation5 + $0x540] sm:$0xff]  ;;  %v1678_v55 = vpack.c.bf16 %v297_v48, %v293_v47  ;;  %v301_v59 = vld [vmem:[#allocation5 + $0x698] sm:$0xff] }
  0x9d   :  { %1641 = vmatpush1.bf16.msra.mxu1 %v1640_v4  ;;  %1447 = vmatprep.subr.bf16.mxu0 %v1446_v5  ;;  %v262_v4 = vld [vmem:[#allocation5 + $0x560] sm:$0xff]  ;;  %v260_v5 = vld [vmem:[#allocation5 + $0x550] sm:$0xff]  ;;  %v305_v60 = vld [vmem:[#allocation5 + $0x6b8] sm:$0xff] }
  0x9e   :  { %1643 = vmatprep.subr.bf16.mxu1 %v1642_v9  ;;  %v271_v9 = vld [vmem:[#allocation5 + $0x5a8] sm:$0xff]  ;;  %v1468_v12 = vpack.c.bf16 %v262_v4, %v258_v3  ;;  %v1664_v14 = vpack.c.bf16 %v264_v7, %v260_v5  ;;  %v1682_v3 = vpack.c.bf16 %v305_v60, %v301_v59  ;;  %v304_v4 = vld [vmem:[#allocation5 + $0x6b0] sm:$0xff]  ;;  %v309_v7 = vld [vmem:[#allocation5 + $0x6d8] sm:$0xff] }
  0x9f   :  { %573 = vmatmul.mubr.f32.vlgmr.msra.gmra.mrb[0].mxu0 %v83_v15  ;;  %v307_v5 = vld [vmem:[#allocation5 + $0x6c8] sm:$0xff]  ;;  %v321_v20 = vld [vmem:[#allocation5 + $0x738] sm:$0xff]  ;;  %v322_v36 = vld [vmem:[#allocation5 + $0x740] sm:$0xff] }
  0xa0   :  { %1449 = vmatpush1.bf16.msra.mxu0 %v1448_v16  ;;  %857 = vmatmul.mubr.f32.vlgmr.msra.gmra.mrb[0].mxu1 %v83_v15  ;;  %v1470_v15 = vpack.c.bf16 %v271_v9, %v267_v8  ;;  %v270_v16 = vld [vmem:[#allocation5 + $0x5a0] sm:$0xff]  ;;  %v313_v8 = vld [vmem:[#allocation5 + $0x6f8] sm:$0xff] }
  0xa1   :  { %1645 = vmatpush1.bf16.msra.mxu1 %v1644_v17  ;;  %1451 = vmatprep.subr.bf16.mxu0 %v1450_v18  ;;  %v268_v17 = vld [vmem:[#allocation5 + $0x590] sm:$0xff]  ;;  %v1472_v25 = vpack.c.bf16 %v270_v16, %v266_v13  ;;  %v310_v13 = vld [vmem:[#allocation5 + $0x6e0] sm:$0xff] }
  0xa2   :  { %1647 = vmatprep.subr.bf16.mxu1 %v1646_v22  ;;  %v272_v18 = vld [vmem:[#allocation5 + $0x5b0] sm:$0xff]  ;;  %v86_v22 = vld [vmem:[#allocation2 + $0x18] sm:$0xff] }
  0xa3   :  { %643 = vmatprep.mubr.f32.mxu0 %v86_v22  ;;  %927 = vmatprep.mubr.f32.mxu1 %v86_v22  ;;  %v1668_v26 = vpack.c.bf16 %v272_v18, %v268_v17  ;;  %v312_v16 = vld [vmem:[#allocation5 + $0x6f0] sm:$0xff]  ;;  %v315_v17 = vld [vmem:[#allocation5 + $0x708] sm:$0xff]  ;;  %v330_v48 = vld [vmem:[#allocation5 + $0x780] sm:$0xff] }
  0xa4   :  { %1453 = vmatpush1.bf16.msra.mxu0 %v1452_v28  ;;  %v274_v28 = vld [vmem:[#allocation5 + $0x5c0] sm:$0xff]  ;;  %v319_v18 = vld [vmem:[#allocation5 + $0x728] sm:$0xff] }
  0xa5   :  { %1649 = vmatpush1.bf16.msra.mxu1 %v1648_v29  ;;  %1455 = vmatprep.subr.bf16.mxu0 %v1454_v30  ;;  %v278_v29 = vld [vmem:[#allocation5 + $0x5e0] sm:$0xff]  ;;  %v276_v30 = vld [vmem:[#allocation5 + $0x5d0] sm:$0xff]  ;;  %v1494_v23 = vpack.c.bf16 %v319_v18, %v315_v17  ;;  %v85_v17 = vld [vmem:[#allocation2 + $0x10] sm:$0xff] }
  0xa6   :  { %1651 = vmatprep.subr.bf16.mxu1 %v1650_v34  ;;  %v287_v34 = vld [vmem:[#allocation5 + $0x628] sm:$0xff]  ;;  %v1476_v37 = vpack.c.bf16 %v278_v29, %v274_v28  ;;  %v1672_v38 = vpack.c.bf16 %v280_v32, %v276_v30  ;;  %v320_v28 = vld [vmem:[#allocation5 + $0x730] sm:$0xff]  ;;  %v329_v32 = vld [vmem:[#allocation5 + $0x778] sm:$0xff] }
  0xa7   :  { %v1478_v39 = vpack.c.bf16 %v287_v34, %v283_v33  ;;  %v323_v29 = vld [vmem:[#allocation5 + $0x748] sm:$0xff]  ;;  %v338_v60 = vld [vmem:[#allocation5 + $0x7c0] sm:$0xff] }
  0xa8   :  { %1457 = vmatpush1.bf16.msra.mxu0 %v1456_v40  ;;  %v282_v40 = vld [vmem:[#allocation5 + $0x600] sm:$0xff]  ;;  %v327_v30 = vld [vmem:[#allocation5 + $0x768] sm:$0xff] }
  0xa9   :  { %1653 = vmatpush1.bf16.msra.mxu1 %v1652_v41  ;;  %1459 = vmatprep.subr.bf16.mxu0 %v1458_v42  ;;  %v286_v41 = vld [vmem:[#allocation5 + $0x620] sm:$0xff]  ;;  %v284_v42 = vld [vmem:[#allocation5 + $0x610] sm:$0xff]  ;;  %v1498_v35 = vpack.c.bf16 %v327_v30, %v323_v29  ;;  %v369_v29 = vld [vmem:[#allocation5 + $0x8b8] sm:$0xff] }
  0xaa   :  { %1655 = vmatprep.subr.bf16.mxu1 %v1654_v46  ;;  %v295_v46 = vld [vmem:[#allocation5 + $0x668] sm:$0xff]  ;;  %v1480_v49 = vpack.c.bf16 %v286_v41, %v282_v40  ;;  %v1676_v50 = vpack.c.bf16 %v288_v44, %v284_v42  ;;  %v328_v40 = vld [vmem:[#allocation5 + $0x770] sm:$0xff]  ;;  %v337_v44 = vld [vmem:[#allocation5 + $0x7b8] sm:$0xff] }
  0xab   :  { %v1482_v51 = vpack.c.bf16 %v295_v46, %v291_v45  ;;  %v331_v41 = vld [vmem:[#allocation5 + $0x788] sm:$0xff]  ;;  %v88_v30 = vld [vmem:[#allocation2 + $0x28] sm:$0xff] }
  0xac   :  { %1461 = vmatpush1.bf16.msra.mxu0 %v1460_v52  ;;  %v290_v52 = vld [vmem:[#allocation5 + $0x640] sm:$0xff]  ;;  %v335_v42 = vld [vmem:[#allocation5 + $0x7a8] sm:$0xff] }
  0xad   :  { %1657 = vmatpush1.bf16.msra.mxu1 %v1656_v53  ;;  %1463 = vmatprep.subr.bf16.mxu0 %v1462_v54  ;;  %v294_v53 = vld [vmem:[#allocation5 + $0x660] sm:$0xff]  ;;  %v292_v54 = vld [vmem:[#allocation5 + $0x650] sm:$0xff]  ;;  %v1502_v47 = vpack.c.bf16 %v335_v42, %v331_v41  ;;  %v373_v41 = vld [vmem:[#allocation5 + $0x8d8] sm:$0xff] }
  0xae   :  { %1659 = vmatprep.subr.bf16.mxu1 %v1658_v58  ;;  %v303_v58 = vld [vmem:[#allocation5 + $0x6a8] sm:$0xff]  ;;  %v1484_v61 = vpack.c.bf16 %v294_v53, %v290_v52  ;;  %v1680_v62 = vpack.c.bf16 %v296_v56, %v292_v54  ;;  %v336_v52 = vld [vmem:[#allocation5 + $0x7b0] sm:$0xff]  ;;  %v345_v56 = vld [vmem:[#allocation5 + $0x7f8] sm:$0xff] }
  0xaf   :  { %v1486_v63 = vpack.c.bf16 %v303_v58, %v299_v57  ;;  %v339_v53 = vld [vmem:[#allocation5 + $0x7c8] sm:$0xff]  ;;  %v377_v42 = vld [vmem:[#allocation5 + $0x8f8] sm:$0xff] }
  0xb0   :  { %1465 = vmatpush1.bf16.msra.mxu0 %v1464_v0  ;;  %v298_v0 = vld [vmem:[#allocation5 + $0x680] sm:$0xff]  ;;  %v343_v54 = vld [vmem:[#allocation5 + $0x7e8] sm:$0xff] }
  0xb1   :  { %1661 = vmatpush1.bf16.msra.mxu1 %v1660_v1  ;;  %1467 = vmatprep.subr.bf16.mxu0 %v1466_v2  ;;  %v302_v1 = vld [vmem:[#allocation5 + $0x6a0] sm:$0xff]  ;;  %v300_v2 = vld [vmem:[#allocation5 + $0x690] sm:$0xff]  ;;  %v1506_v59 = vpack.c.bf16 %v343_v54, %v339_v53  ;;  %v381_v53 = vld [vmem:[#allocation5 + $0x918] sm:$0xff] }
  0xb2   :  { %1663 = vmatprep.subr.bf16.mxu1 %v1662_v6  ;;  %v311_v6 = vld [vmem:[#allocation5 + $0x6e8] sm:$0xff]  ;;  %v1488_v9 = vpack.c.bf16 %v302_v1, %v298_v0  ;;  %v1684_v10 = vpack.c.bf16 %v304_v4, %v300_v2  ;;  %v344_v0 = vld [vmem:[#allocation5 + $0x7f0] sm:$0xff]  ;;  %v353_v4 = vld [vmem:[#allocation5 + $0x838] sm:$0xff] }
  0xb3   :  { %v1490_v11 = vpack.c.bf16 %v311_v6, %v307_v5  ;;  %v347_v1 = vld [vmem:[#allocation5 + $0x808] sm:$0xff]  ;;  %v385_v54 = vld [vmem:[#allocation5 + $0x938] sm:$0xff] }
  0xb4   :  { %1469 = vmatpush1.bf16.msra.mxu0 %v1468_v12  ;;  %v306_v12 = vld [vmem:[#allocation5 + $0x6c0] sm:$0xff]  ;;  %v351_v2 = vld [vmem:[#allocation5 + $0x828] sm:$0xff] }
  0xb5   :  { %1665 = vmatpush1.bf16.msra.mxu1 %v1664_v14  ;;  %1471 = vmatprep.subr.bf16.mxu0 %v1470_v15  ;;  %v308_v14 = vld [vmem:[#allocation5 + $0x6d0] sm:$0xff]  ;;  %v1686_v15 = vpack.c.bf16 %v313_v8, %v309_v7  ;;  %v1492_v21 = vpack.c.bf16 %v310_v13, %v306_v12  ;;  %v1510_v7 = vpack.c.bf16 %v351_v2, %v347_v1  ;;  %v346_v8 = vld [vmem:[#allocation5 + $0x800] sm:$0xff]  ;;  %v355_v13 = vld [vmem:[#allocation5 + $0x848] sm:$0xff] }
  0xb6   :  { %1667 = vmatprep.subr.bf16.mxu1 %v1666_v19  ;;  %v317_v19 = vld [vmem:[#allocation5 + $0x718] sm:$0xff]  ;;  %v1688_v22 = vpack.c.bf16 %v312_v16, %v308_v14  ;;  %v352_v12 = vld [vmem:[#allocation5 + $0x830] sm:$0xff]  ;;  %v359_v14 = vld [vmem:[#allocation5 + $0x868] sm:$0xff] }
  0xb7   :  { %v361_v16 = vld [vmem:[#allocation5 + $0x878] sm:$0xff] }
  0xb8   :  { %1473 = vmatpush1.bf16.msra.mxu0 %v1472_v25  ;;  %v318_v25 = vld [vmem:[#allocation5 + $0x720] sm:$0xff]  ;;  %v389_v1 = vld [vmem:[#allocation5 + $0x958] sm:$0xff] }
  0xb9   :  { %1669 = vmatpush1.bf16.msra.mxu1 %v1668_v26  ;;  %1475 = vmatprep.subr.bf16.mxu0 %v1474_v27  ;;  %v316_v26 = vld [vmem:[#allocation5 + $0x710] sm:$0xff]  ;;  %v1690_v27 = vpack.c.bf16 %v321_v20, %v317_v19  ;;  %v1496_v33 = vpack.c.bf16 %v318_v25, %v314_v24  ;;  %v1514_v20 = vpack.c.bf16 %v359_v14, %v355_v13  ;;  %v393_v2 = vld [vmem:[#allocation5 + $0x978] sm:$0xff] }
  0xba   :  { %1671 = vmatprep.subr.bf16.mxu1 %v1670_v31  ;;  %v325_v31 = vld [vmem:[#allocation5 + $0x758] sm:$0xff]  ;;  %v1692_v34 = vpack.c.bf16 %v320_v28, %v316_v26  ;;  %v360_v25 = vld [vmem:[#allocation5 + $0x870] sm:$0xff]  ;;  %v363_v26 = vld [vmem:[#allocation5 + $0x888] sm:$0xff] }
  0xbb   :  { %v365_v28 = vld [vmem:[#allocation5 + $0x898] sm:$0xff] }
  0xbc   :  { %1477 = vmatpush1.bf16.msra.mxu0 %v1476_v37  ;;  %v326_v37 = vld [vmem:[#allocation5 + $0x760] sm:$0xff]  ;;  %v397_v13 = vld [vmem:[#allocation5 + $0x998] sm:$0xff] }
  0xbd   :  { %1673 = vmatpush1.bf16.msra.mxu1 %v1672_v38  ;;  %1479 = vmatprep.subr.bf16.mxu0 %v1478_v39  ;;  %v324_v38 = vld [vmem:[#allocation5 + $0x750] sm:$0xff]  ;;  %v1694_v39 = vpack.c.bf16 %v329_v32, %v325_v31  ;;  %v1500_v45 = vpack.c.bf16 %v326_v37, %v322_v36  ;;  %v1714_v37 = vpack.c.bf16 %v369_v29, %v365_v28  ;;  %v401_v14 = vld [vmem:[#allocation5 + $0x9b8] sm:$0xff] }
  0xbe   :  { %1675 = vmatprep.subr.bf16.mxu1 %v1674_v43  ;;  %v333_v43 = vld [vmem:[#allocation5 + $0x798] sm:$0xff]  ;;  %v1696_v46 = vpack.c.bf16 %v328_v40, %v324_v38  ;;  %v364_v36 = vld [vmem:[#allocation5 + $0x890] sm:$0xff]  ;;  %v375_v40 = vld [vmem:[#allocation5 + $0x8e8] sm:$0xff] }
  0xbf   :  { %v368_v38 = vld [vmem:[#allocation5 + $0x8b0] sm:$0xff] }
  0xc0   :  { %1481 = vmatpush1.bf16.msra.mxu0 %v1480_v49  ;;  %v334_v49 = vld [vmem:[#allocation5 + $0x7a0] sm:$0xff] }
  0xc1   :  { %1677 = vmatpush1.bf16.msra.mxu1 %v1676_v50  ;;  %1483 = vmatprep.subr.bf16.mxu0 %v1482_v51  ;;  %v332_v50 = vld [vmem:[#allocation5 + $0x790] sm:$0xff]  ;;  %v1698_v51 = vpack.c.bf16 %v337_v44, %v333_v43  ;;  %v1504_v57 = vpack.c.bf16 %v334_v49, %v330_v48  ;;  %v1716_v44 = vpack.c.bf16 %v368_v38, %v364_v36  ;;  %v415_v36 = vld [vmem:[#allocation5 + $0xa28] sm:$0xff]  ;;  %v417_v38 = vld [vmem:[#allocation5 + $0xa38] sm:$0xff] }
  0xc2   :  { %1679 = vmatprep.subr.bf16.mxu1 %v1678_v55  ;;  %v341_v55 = vld [vmem:[#allocation5 + $0x7d8] sm:$0xff]  ;;  %v1700_v58 = vpack.c.bf16 %v336_v52, %v332_v50  ;;  %v372_v48 = vld [vmem:[#allocation5 + $0x8d0] sm:$0xff]  ;;  %v1718_v49 = vpack.c.bf16 %v377_v42, %v373_v41  ;;  %v383_v52 = vld [vmem:[#allocation5 + $0x928] sm:$0xff] }
  0xc3   :  { %v376_v50 = vld [vmem:[#allocation5 + $0x8f0] sm:$0xff]  ;;  %v410_v42 = vld [vmem:[#allocation5 + $0xa00] sm:$0xff] }
  0xc4   :  { %1485 = vmatpush1.bf16.msra.mxu0 %v1484_v61  ;;  %v342_v61 = vld [vmem:[#allocation5 + $0x7e0] sm:$0xff] }
  0xc5   :  { %1681 = vmatpush1.bf16.msra.mxu1 %v1680_v62  ;;  %1487 = vmatprep.subr.bf16.mxu0 %v1486_v63  ;;  %v340_v62 = vld [vmem:[#allocation5 + $0x7d0] sm:$0xff]  ;;  %v1702_v63 = vpack.c.bf16 %v345_v56, %v341_v55  ;;  %v1508_v5 = vpack.c.bf16 %v342_v61, %v338_v60  ;;  %v1720_v56 = vpack.c.bf16 %v376_v50, %v372_v48  ;;  %v423_v48 = vld [vmem:[#allocation5 + $0xa68] sm:$0xff]  ;;  %v425_v50 = vld [vmem:[#allocation5 + $0xa78] sm:$0xff] }
  0xc6   :  { %1683 = vmatprep.subr.bf16.mxu1 %v1682_v3  ;;  %v349_v3 = vld [vmem:[#allocation5 + $0x818] sm:$0xff]  ;;  %v1704_v6 = vpack.c.bf16 %v344_v0, %v340_v62  ;;  %v380_v60 = vld [vmem:[#allocation5 + $0x910] sm:$0xff]  ;;  %v1722_v61 = vpack.c.bf16 %v385_v54, %v381_v53  ;;  %v391_v0 = vld [vmem:[#allocation5 + $0x968] sm:$0xff] }
  0xc7   :  { %v384_v62 = vld [vmem:[#allocation5 + $0x930] sm:$0xff]  ;;  %v418_v54 = vld [vmem:[#allocation5 + $0xa40] sm:$0xff] }
  0xc8   :  { %1489 = vmatpush1.bf16.msra.mxu0 %v1488_v9  ;;  %v350_v9 = vld [vmem:[#allocation5 + $0x820] sm:$0xff] }
  0xc9   :  { %1685 = vmatpush1.bf16.msra.mxu1 %v1684_v10  ;;  %1491 = vmatprep.subr.bf16.mxu0 %v1490_v11  ;;  %v348_v10 = vld [vmem:[#allocation5 + $0x810] sm:$0xff]  ;;  %v1706_v11 = vpack.c.bf16 %v353_v4, %v349_v3  ;;  %v1512_v18 = vpack.c.bf16 %v350_v9, %v346_v8  ;;  %v1724_v4 = vpack.c.bf16 %v384_v62, %v380_v60  ;;  %v431_v60 = vld [vmem:[#allocation5 + $0xaa8] sm:$0xff]  ;;  %v433_v62 = vld [vmem:[#allocation5 + $0xab8] sm:$0xff] }
  0xca   :  { %1687 = vmatprep.subr.bf16.mxu1 %v1686_v15  ;;  %v357_v15 = vld [vmem:[#allocation5 + $0x858] sm:$0xff]  ;;  %v1708_v19 = vpack.c.bf16 %v352_v12, %v348_v10  ;;  %v388_v8 = vld [vmem:[#allocation5 + $0x950] sm:$0xff]  ;;  %v1726_v9 = vpack.c.bf16 %v393_v2, %v389_v1  ;;  %v399_v12 = vld [vmem:[#allocation5 + $0x9a8] sm:$0xff] }
  0xcb   :  { %v1710_v24 = vpack.c.bf16 %v361_v16, %v357_v15  ;;  %v392_v10 = vld [vmem:[#allocation5 + $0x970] sm:$0xff]  ;;  %v426_v2 = vld [vmem:[#allocation5 + $0xa80] sm:$0xff] }
  0xcc   :  { %1493 = vmatpush1.bf16.msra.mxu0 %v1492_v21  ;;  %v354_v21 = vld [vmem:[#allocation5 + $0x840] sm:$0xff]  ;;  %v1728_v16 = vpack.c.bf16 %v392_v10, %v388_v8  ;;  %v439_v8 = vld [vmem:[#allocation5 + $0xae8] sm:$0xff]  ;;  %v441_v10 = vld [vmem:[#allocation5 + $0xaf8] sm:$0xff] }
  0xcd   :  { %1689 = vmatpush1.bf16.msra.mxu1 %v1688_v22  ;;  %1495 = vmatprep.subr.bf16.mxu0 %v1494_v23  ;;  %v358_v22 = vld [vmem:[#allocation5 + $0x860] sm:$0xff]  ;;  %v356_v23 = vld [vmem:[#allocation5 + $0x850] sm:$0xff] }
  0xce   :  { %1691 = vmatprep.subr.bf16.mxu1 %v1690_v27  ;;  %v367_v27 = vld [vmem:[#allocation5 + $0x8a8] sm:$0xff]  ;;  %v1516_v31 = vpack.c.bf16 %v358_v22, %v354_v21  ;;  %v1712_v32 = vpack.c.bf16 %v360_v25, %v356_v23  ;;  %v1730_v21 = vpack.c.bf16 %v401_v14, %v397_v13  ;;  %v400_v22 = vld [vmem:[#allocation5 + $0x9b0] sm:$0xff]  ;;  %v405_v25 = vld [vmem:[#allocation5 + $0x9d8] sm:$0xff] }
  0xcf   :  { %v403_v23 = vld [vmem:[#allocation5 + $0x9c8] sm:$0xff]  ;;  %v434_v14 = vld [vmem:[#allocation5 + $0xac0] sm:$0xff] }
  0xd0   :  { %1497 = vmatpush1.bf16.msra.mxu0 %v1496_v33  ;;  %v1518_v33 = vpack.c.bf16 %v367_v27, %v363_v26  ;;  %v409_v26 = vld [vmem:[#allocation5 + $0x9f8] sm:$0xff] }
  0xd1   :  { %1693 = vmatpush1.bf16.msra.mxu1 %v1692_v34  ;;  %1499 = vmatprep.subr.bf16.mxu0 %v1498_v35  ;;  %v362_v34 = vld [vmem:[#allocation5 + $0x880] sm:$0xff] }
  0xd2   :  { %1695 = vmatprep.subr.bf16.mxu1 %v1694_v39  ;;  %v366_v35 = vld [vmem:[#allocation5 + $0x8a0] sm:$0xff]  ;;  %v371_v39 = vld [vmem:[#allocation5 + $0x8c8] sm:$0xff] }
  0xd3   :  { %v1520_v43 = vpack.c.bf16 %v366_v35, %v362_v34  ;;  %v408_v34 = vld [vmem:[#allocation5 + $0x9f0] sm:$0xff]  ;;  %v411_v35 = vld [vmem:[#allocation5 + $0xa08] sm:$0xff] }
  0xd4   :  { %1501 = vmatpush1.bf16.msra.mxu0 %v1500_v45  ;;  %v1522_v45 = vpack.c.bf16 %v375_v40, %v371_v39  ;;  %v1542_v41 = vpack.c.bf16 %v415_v36, %v411_v35 }
  0xd5   :  { %1697 = vmatpush1.bf16.msra.mxu1 %v1696_v46  ;;  %1503 = vmatprep.subr.bf16.mxu0 %v1502_v47  ;;  %v370_v46 = vld [vmem:[#allocation5 + $0x8c0] sm:$0xff] }
  0xd6   :  { %1699 = vmatprep.subr.bf16.mxu1 %v1698_v51  ;;  %v374_v47 = vld [vmem:[#allocation5 + $0x8e0] sm:$0xff]  ;;  %v379_v51 = vld [vmem:[#allocation5 + $0x908] sm:$0xff] }
  0xd7   :  { %v1524_v55 = vpack.c.bf16 %v374_v47, %v370_v46  ;;  %v416_v46 = vld [vmem:[#allocation5 + $0xa30] sm:$0xff]  ;;  %v419_v47 = vld [vmem:[#allocation5 + $0xa48] sm:$0xff] }
  0xd8   :  { %1505 = vmatpush1.bf16.msra.mxu0 %v1504_v57  ;;  %v1526_v57 = vpack.c.bf16 %v383_v52, %v379_v51  ;;  %v1546_v53 = vpack.c.bf16 %v423_v48, %v419_v47 }
  0xd9   :  { %1701 = vmatpush1.bf16.msra.mxu1 %v1700_v58  ;;  %1507 = vmatprep.subr.bf16.mxu0 %v1506_v59  ;;  %v378_v58 = vld [vmem:[#allocation5 + $0x900] sm:$0xff] }
  0xda   :  { %1703 = vmatprep.subr.bf16.mxu1 %v1702_v63  ;;  %v382_v59 = vld [vmem:[#allocation5 + $0x920] sm:$0xff]  ;;  %v387_v63 = vld [vmem:[#allocation5 + $0x948] sm:$0xff] }
  0xdb   :  { %v1528_v3 = vpack.c.bf16 %v382_v59, %v378_v58  ;;  %v424_v58 = vld [vmem:[#allocation5 + $0xa70] sm:$0xff]  ;;  %v427_v59 = vld [vmem:[#allocation5 + $0xa88] sm:$0xff] }
  0xdc   :  { %1509 = vmatpush1.bf16.msra.mxu0 %v1508_v5  ;;  %v1530_v5 = vpack.c.bf16 %v391_v0, %v387_v63  ;;  %v1550_v1 = vpack.c.bf16 %v431_v60, %v427_v59 }
  0xdd   :  { %1705 = vmatpush1.bf16.msra.mxu1 %v1704_v6  ;;  %1511 = vmatprep.subr.bf16.mxu0 %v1510_v7  ;;  %v386_v6 = vld [vmem:[#allocation5 + $0x940] sm:$0xff] }
  0xde   :  { %1707 = vmatprep.subr.bf16.mxu1 %v1706_v11  ;;  %v390_v7 = vld [vmem:[#allocation5 + $0x960] sm:$0xff]  ;;  %v395_v11 = vld [vmem:[#allocation5 + $0x988] sm:$0xff] }
  0xdf   :  { %644 = vmatmul.mubr.f32.vlgmr.msra.gmra.mrb[0].mxu0 %v85_v17  ;;  %v1532_v15 = vpack.c.bf16 %v390_v7, %v386_v6  ;;  %v432_v6 = vld [vmem:[#allocation5 + $0xab0] sm:$0xff]  ;;  %v435_v7 = vld [vmem:[#allocation5 + $0xac8] sm:$0xff] }
  0xe0   :  { %1513 = vmatpush1.bf16.msra.mxu0 %v1512_v18  ;;  %928 = vmatmul.mubr.f32.vlgmr.msra.gmra.mrb[0].mxu1 %v85_v17  ;;  %v1534_v17 = vpack.c.bf16 %v399_v12, %v395_v11  ;;  %v394_v18 = vld [vmem:[#allocation5 + $0x980] sm:$0xff]  ;;  %v1554_v13 = vpack.c.bf16 %v439_v8, %v435_v7 }
  0xe1   :  { %1709 = vmatpush1.bf16.msra.mxu1 %v1708_v19  ;;  %1515 = vmatprep.subr.bf16.mxu0 %v1514_v20  ;;  %v398_v19 = vld [vmem:[#allocation5 + $0x9a0] sm:$0xff]  ;;  %v396_v20 = vld [vmem:[#allocation5 + $0x990] sm:$0xff] }
  0xe2   :  { %1711 = vmatprep.subr.bf16.mxu1 %v1710_v24  ;;  %714 = vmatprep.mubr.f32.mxu0 %v88_v30  ;;  %v407_v24 = vld [vmem:[#allocation5 + $0x9e8] sm:$0xff]  ;;  %v1536_v27 = vpack.c.bf16 %v398_v19, %v394_v18  ;;  %v1732_v28 = vpack.c.bf16 %v400_v22, %v396_v20  ;;  %v440_v18 = vld [vmem:[#allocation5 + $0xaf0] sm:$0xff]  ;;  %v449_v22 = vld [vmem:[#allocation5 + $0xb38] sm:$0xff] }
  0xe3   :  { %998 = vmatprep.mubr.f32.mxu1 %v88_v30  ;;  %v1538_v29 = vpack.c.bf16 %v407_v24, %v403_v23  ;;  %v402_v30 = vld [vmem:[#allocation5 + $0x9c0] sm:$0xff]  ;;  %v443_v19 = vld [vmem:[#allocation5 + $0xb08] sm:$0xff] }
  0xe4   :  { %1517 = vmatpush1.bf16.msra.mxu0 %v1516_v31  ;;  %v406_v31 = vld [vmem:[#allocation5 + $0x9e0] sm:$0xff]  ;;  %v447_v20 = vld [vmem:[#allocation5 + $0xb28] sm:$0xff] }
  0xe5   :  { %1713 = vmatpush1.bf16.msra.mxu1 %v1712_v32  ;;  %1519 = vmatprep.subr.bf16.mxu0 %v1518_v33  ;;  %v404_v32 = vld [vmem:[#allocation5 + $0x9d0] sm:$0xff]  ;;  %v1734_v33 = vpack.c.bf16 %v409_v26, %v405_v25  ;;  %v1540_v39 = vpack.c.bf16 %v406_v31, %v402_v30  ;;  %v1558_v25 = vpack.c.bf16 %v447_v20, %v443_v19  ;;  %v442_v26 = vld [vmem:[#allocation5 + $0xb00] sm:$0xff]  ;;  %v451_v31 = vld [vmem:[#allocation5 + $0xb48] sm:$0xff] }
  0xe6   :  { %1715 = vmatprep.subr.bf16.mxu1 %v1714_v37  ;;  %v413_v37 = vld [vmem:[#allocation5 + $0xa18] sm:$0xff]  ;;  %v1736_v40 = vpack.c.bf16 %v408_v34, %v404_v32  ;;  %v448_v30 = vld [vmem:[#allocation5 + $0xb30] sm:$0xff]  ;;  %v455_v32 = vld [vmem:[#allocation5 + $0xb68] sm:$0xff] }
  0xe7   :  { %v457_v34 = vld [vmem:[#allocation5 + $0xb78] sm:$0xff]  ;;  %v1128_v19 = vld [vmem:[#allocation8 + $0x180] sm:$0xff]  ;;  %v1129_v20 = vld [vmem:[#allocation8 + $0x188] sm:$0xff] }
  0xe8   :  { %1521 = vmatpush1.bf16.msra.mxu0 %v1520_v43  ;;  %v414_v43 = vld [vmem:[#allocation5 + $0xa20] sm:$0xff] }
  0xe9   :  { %1717 = vmatpush1.bf16.msra.mxu1 %v1716_v44  ;;  %1523 = vmatprep.subr.bf16.mxu0 %v1522_v45  ;;  %v412_v44 = vld [vmem:[#allocation5 + $0xa10] sm:$0xff]  ;;  %v1738_v45 = vpack.c.bf16 %v417_v38, %v413_v37  ;;  %v1544_v51 = vpack.c.bf16 %v414_v43, %v410_v42  ;;  %v1562_v37 = vpack.c.bf16 %v455_v32, %v451_v31  ;;  %v450_v38 = vld [vmem:[#allocation5 + $0xb40] sm:$0xff]  ;;  %v459_v43 = vld [vmem:[#allocation5 + $0xb88] sm:$0xff] }
  0xea   :  { %1719 = vmatprep.subr.bf16.mxu1 %v1718_v49  ;;  %v421_v49 = vld [vmem:[#allocation5 + $0xa58] sm:$0xff]  ;;  %v1740_v52 = vpack.c.bf16 %v416_v46, %v412_v44  ;;  %v456_v42 = vld [vmem:[#allocation5 + $0xb70] sm:$0xff]  ;;  %v463_v44 = vld [vmem:[#allocation5 + $0xba8] sm:$0xff] }
  0xeb   :  { %v465_v46 = vld [vmem:[#allocation5 + $0xbb8] sm:$0xff] }
  0xec   :  { %1525 = vmatpush1.bf16.msra.mxu0 %v1524_v55  ;;  %v422_v55 = vld [vmem:[#allocation5 + $0xa60] sm:$0xff]  ;;  %v1130_v31 = vld [vmem:[#allocation8 + $0x190] sm:$0xff] }
  0xed   :  { %1721 = vmatpush1.bf16.msra.mxu1 %v1720_v56  ;;  %1527 = vmatprep.subr.bf16.mxu0 %v1526_v57  ;;  %v420_v56 = vld [vmem:[#allocation5 + $0xa50] sm:$0xff]  ;;  %v1742_v57 = vpack.c.bf16 %v425_v50, %v421_v49  ;;  %v1548_v63 = vpack.c.bf16 %v422_v55, %v418_v54  ;;  %v1566_v49 = vpack.c.bf16 %v463_v44, %v459_v43  ;;  %v458_v50 = vld [vmem:[#allocation5 + $0xb80] sm:$0xff]  ;;  %v467_v55 = vld [vmem:[#allocation5 + $0xbc8] sm:$0xff] }
  0xee   :  { %1723 = vmatprep.subr.bf16.mxu1 %v1722_v61  ;;  %v429_v61 = vld [vmem:[#allocation5 + $0xa98] sm:$0xff]  ;;  %v1744_v0 = vpack.c.bf16 %v424_v58, %v420_v56  ;;  %v464_v54 = vld [vmem:[#allocation5 + $0xbb0] sm:$0xff]  ;;  %v471_v56 = vld [vmem:[#allocation5 + $0xbe8] sm:$0xff] }
  0xef   :  { %v473_v58 = vld [vmem:[#allocation5 + $0xbf8] sm:$0xff]  ;;  %v1101_v43 = vld [vmem:[#allocation8 + $0xa8] sm:$0xff]  ;;  %v1132_v44 = vld [vmem:[#allocation8 + $0x1a0] sm:$0xff] }
  0xf0   :  { %1529 = vmatpush1.bf16.msra.mxu0 %v1528_v3  ;;  %v430_v3 = vld [vmem:[#allocation5 + $0xaa0] sm:$0xff] }
  0xf1   :  { %1725 = vmatpush1.bf16.msra.mxu1 %v1724_v4  ;;  %1531 = vmatprep.subr.bf16.mxu0 %v1530_v5  ;;  %v428_v4 = vld [vmem:[#allocation5 + $0xa90] sm:$0xff]  ;;  %v1746_v5 = vpack.c.bf16 %v433_v62, %v429_v61  ;;  %v1552_v11 = vpack.c.bf16 %v430_v3, %v426_v2  ;;  %v1570_v61 = vpack.c.bf16 %v471_v56, %v467_v55  ;;  %v466_v62 = vld [vmem:[#allocation5 + $0xbc0] sm:$0xff]  ;;  %v475_v3 = vld [vmem:[#allocation5 + $0xc08] sm:$0xff] }
  0xf2   :  { %1727 = vmatprep.subr.bf16.mxu1 %v1726_v9  ;;  %v437_v9 = vld [vmem:[#allocation5 + $0xad8] sm:$0xff]  ;;  %v1748_v12 = vpack.c.bf16 %v432_v6, %v428_v4  ;;  %v472_v2 = vld [vmem:[#allocation5 + $0xbf0] sm:$0xff]  ;;  %v479_v4 = vld [vmem:[#allocation5 + $0xc28] sm:$0xff] }
  0xf3   :  { %v481_v6 = vld [vmem:[#allocation5 + $0xc38] sm:$0xff] }
  0xf4   :  { %1533 = vmatpush1.bf16.msra.mxu0 %v1532_v15  ;;  %v438_v15 = vld [vmem:[#allocation5 + $0xae0] sm:$0xff]  ;;  %v1134_v56 = vld [vmem:[#allocation8 + $0x1b0] sm:$0xff] }
  0xf5   :  { %1729 = vmatpush1.bf16.msra.mxu1 %v1728_v16  ;;  %1535 = vmatprep.subr.bf16.mxu0 %v1534_v17  ;;  %v436_v16 = vld [vmem:[#allocation5 + $0xad0] sm:$0xff]  ;;  %v1750_v17 = vpack.c.bf16 %v441_v10, %v437_v9  ;;  %v1556_v23 = vpack.c.bf16 %v438_v15, %v434_v14  ;;  %v1574_v9 = vpack.c.bf16 %v479_v4, %v475_v3  ;;  %v474_v10 = vld [vmem:[#allocation5 + $0xc00] sm:$0xff] }
  0xf6   :  { %1731 = vmatprep.subr.bf16.mxu1 %v1730_v21  ;;  %v445_v21 = vld [vmem:[#allocation5 + $0xb18] sm:$0xff]  ;;  %v1752_v24 = vpack.c.bf16 %v440_v18, %v436_v16  ;;  %v480_v14 = vld [vmem:[#allocation5 + $0xc30] sm:$0xff]  ;;  %v1096_v15 = vld [vmem:[#allocation8 + $0x80] sm:$0xff] }
  0xf7   :  { %v1097_v16 = vld [vmem:[#allocation8 + $0x88] sm:$0xff]  ;;  %v1131_v32 = vld [vmem:[#allocation8 + $0x198] sm:$0xff]  ;;  %v1136_v4 = vld [vmem:[#allocation8 + $0x1c0] sm:$0xff] }
  0xf8   :  { %1537 = vmatpush1.bf16.msra.mxu0 %v1536_v27  ;;  %v446_v27 = vld [vmem:[#allocation5 + $0xb20] sm:$0xff]  ;;  %v1105_v3 = vld [vmem:[#allocation8 + $0xc8] sm:$0xff] }
  0xf9   :  { %1733 = vmatpush1.bf16.msra.mxu1 %v1732_v28  ;;  %1539 = vmatprep.subr.bf16.mxu0 %v1538_v29  ;;  %v444_v28 = vld [vmem:[#allocation5 + $0xb10] sm:$0xff]  ;;  %v1754_v29 = vpack.c.bf16 %v449_v22, %v445_v21  ;;  %v1560_v35 = vpack.c.bf16 %v446_v27, %v442_v26  ;;  %v1774_v22 = vpack.c.bf16 %v1097_v16, %v1096_v15  ;;  %v1112_v27 = vld [vmem:[#allocation8 + $0x100] sm:$0xff]  ;;  %v1103_v55 = vld [vmem:[#allocation8 + $0xb8] sm:$0xff] }
  0xfa   :  { %1735 = vmatprep.subr.bf16.mxu1 %v1734_v33  ;;  %v453_v33 = vld [vmem:[#allocation5 + $0xb58] sm:$0xff]  ;;  %v1756_v36 = vpack.c.bf16 %v448_v30, %v444_v28  ;;  %v1081_v26 = vld [vmem:[#allocation8 + $0x8] sm:$0xff] }
  0xfb   :  { %v1113_v28 = vld [vmem:[#allocation8 + $0x108] sm:$0xff]  ;;  %v1099_v30 = vld [vmem:[#allocation8 + $0x98] sm:$0xff]  ;;  %v1138_v16 = vld [vmem:[#allocation8 + $0x1d0] sm:$0xff] }
  0xfc   :  { %1541 = vmatpush1.bf16.msra.mxu0 %v1540_v39  ;;  %v454_v39 = vld [vmem:[#allocation5 + $0xb60] sm:$0xff] }
  0xfd   :  { %1737 = vmatpush1.bf16.msra.mxu1 %v1736_v40  ;;  %1543 = vmatprep.subr.bf16.mxu0 %v1542_v41  ;;  %v452_v40 = vld [vmem:[#allocation5 + $0xb50] sm:$0xff]  ;;  %v1758_v41 = vpack.c.bf16 %v457_v34, %v453_v33  ;;  %v1564_v47 = vpack.c.bf16 %v454_v39, %v450_v38  ;;  %v89_v33 = vld [vmem:[#allocation2 + $0x30] sm:$0xff] }
  0xfe   :  { %1739 = vmatprep.subr.bf16.mxu1 %v1738_v45  ;;  %v461_v45 = vld [vmem:[#allocation5 + $0xb98] sm:$0xff]  ;;  %v1760_v48 = vpack.c.bf16 %v456_v42, %v452_v40  ;;  %v1810_v40 = vpack.c.bf16 %v1131_v32, %v1130_v31  ;;  %v1100_v42 = vld [vmem:[#allocation8 + $0xa0] sm:$0xff] }
  0xff   :  { %v1083_v38 = vld [vmem:[#allocation8 + $0x18] sm:$0xff]  ;;  %v1114_v39 = vld [vmem:[#allocation8 + $0x110] sm:$0xff] }
 0x100   :  { %1545 = vmatpush1.bf16.msra.mxu0 %v1544_v51  ;;  %v462_v51 = vld [vmem:[#allocation5 + $0xba0] sm:$0xff] }
 0x101   :  { %1741 = vmatpush1.bf16.msra.mxu1 %v1740_v52  ;;  %1547 = vmatprep.subr.bf16.mxu0 %v1546_v53  ;;  %v460_v52 = vld [vmem:[#allocation5 + $0xb90] sm:$0xff]  ;;  %v1762_v53 = vpack.c.bf16 %v465_v46, %v461_v45  ;;  %v1568_v59 = vpack.c.bf16 %v462_v51, %v458_v50  ;;  %v1116_v51 = vld [vmem:[#allocation8 + $0x120] sm:$0xff]  ;;  %v1107_v15 = vld [vmem:[#allocation8 + $0xd8] sm:$0xff] }
 0x102   :  { %1743 = vmatprep.subr.bf16.mxu1 %v1742_v57  ;;  %v469_v57 = vld [vmem:[#allocation5 + $0xbd8] sm:$0xff]  ;;  %v1764_v60 = vpack.c.bf16 %v464_v54, %v460_v52  ;;  %v1133_v45 = vld [vmem:[#allocation8 + $0x1a8] sm:$0xff] }
 0x103   :  { %v1085_v50 = vld [vmem:[#allocation8 + $0x28] sm:$0xff]  ;;  %v1814_v52 = vpack.c.bf16 %v1133_v45, %v1132_v44  ;;  %v1102_v54 = vld [vmem:[#allocation8 + $0xb0] sm:$0xff]  ;;  %v1143_v44 = vld [vmem:[#allocation8 + $0x1f8] sm:$0xff] }
 0x104   :  { %1549 = vmatpush1.bf16.msra.mxu0 %v1548_v63  ;;  %v470_v63 = vld [vmem:[#allocation5 + $0xbe0] sm:$0xff]  ;;  %v1094_v45 = vld [vmem:[#allocation8 + $0x70] sm:$0xff] }
 0x105   :  { %1745 = vmatpush1.bf16.msra.mxu1 %v1744_v0  ;;  %1551 = vmatprep.subr.bf16.mxu0 %v1550_v1  ;;  %v468_v0 = vld [vmem:[#allocation5 + $0xbd0] sm:$0xff]  ;;  %v1766_v1 = vpack.c.bf16 %v473_v58, %v469_v57  ;;  %v1572_v7 = vpack.c.bf16 %v470_v63, %v466_v62  ;;  %v1135_v57 = vld [vmem:[#allocation8 + $0x1b8] sm:$0xff] }
 0x106   :  { %1747 = vmatprep.subr.bf16.mxu1 %v1746_v5  ;;  %v477_v5 = vld [vmem:[#allocation5 + $0xc18] sm:$0xff]  ;;  %v1768_v8 = vpack.c.bf16 %v472_v2, %v468_v0  ;;  %v1818_v0 = vpack.c.bf16 %v1135_v57, %v1134_v56  ;;  %v1104_v2 = vld [vmem:[#allocation8 + $0xc0] sm:$0xff] }
 0x107   :  { %v1087_v62 = vld [vmem:[#allocation8 + $0x38] sm:$0xff]  ;;  %v1118_v63 = vld [vmem:[#allocation8 + $0x130] sm:$0xff] }
 0x108   :  { %1553 = vmatpush1.bf16.msra.mxu0 %v1552_v11  ;;  %v478_v11 = vld [vmem:[#allocation5 + $0xc20] sm:$0xff] }
 0x109   :  { %1749 = vmatpush1.bf16.msra.mxu1 %v1748_v12  ;;  %1555 = vmatprep.subr.bf16.mxu0 %v1554_v13  ;;  %v1770_v12 = vpack.c.bf16 %v481_v6, %v477_v5  ;;  %v476_v13 = vld [vmem:[#allocation5 + $0xc10] sm:$0xff]  ;;  %v1576_v18 = vpack.c.bf16 %v478_v11, %v474_v10  ;;  %v1120_v11 = vld [vmem:[#allocation8 + $0x140] sm:$0xff] }
 0x10a   :  { %1751 = vmatprep.subr.bf16.mxu1 %v1750_v17  ;;  %v87_v17 = vld [vmem:[#allocation2 + $0x20] sm:$0xff]  ;;  %v1772_v21 = vpack.c.bf16 %v480_v14, %v476_v13  ;;  %v1106_v14 = vld [vmem:[#allocation8 + $0xd0] sm:$0xff] }
 0x10b   :  { %v1137_v5 = vld [vmem:[#allocation8 + $0x1c8] sm:$0xff] }
 0x10c   :  { %1557 = vmatpush1.bf16.msra.mxu0 %v1556_v23  ;;  %v1806_v23 = vpack.c.bf16 %v1129_v20, %v1128_v19  ;;  %v1089_v10 = vld [vmem:[#allocation8 + $0x48] sm:$0xff]  ;;  %v1794_v20 = vpack.c.bf16 %v1107_v15, %v1106_v14 }
 0x10d   :  { %1753 = vmatpush1.bf16.msra.mxu1 %v1752_v24  ;;  %1559 = vmatprep.subr.bf16.mxu0 %v1558_v25  ;;  %v2014_v24 = vmov 0.0   ;;  %v1080_v25 = vld [vmem:[#allocation8] sm:$0xff]  ;;  %v1121_v13 = vld [vmem:[#allocation8 + $0x148] sm:$0xff] }
 0x10e   :  { %1755 = vmatprep.subr.bf16.mxu1 %v1754_v29  ;;  %v1098_v29 = vld [vmem:[#allocation8 + $0x90] sm:$0xff]  ;;  %v1776_v34 = vpack.c.bf16 %v1081_v26, %v1080_v25  ;;  %v1824_v19 = vpack.c.bf16 %v1121_v13, %v1120_v11  ;;  %v1123_v25 = vld [vmem:[#allocation8 + $0x158] sm:$0xff]  ;;  %v1108_v26 = vld [vmem:[#allocation8 + $0xe0] sm:$0xff] }
 0x10f   :  { %v1311_v13 = vld [vmem:[#allocation10] ss:$0 sm:$0xff] }
 0x110   :  { %1561 = vmatpush1.bf16.msra.mxu0 %v1560_v35  ;;  %v1808_v35 = vpack.c.bf16 %v1113_v28, %v1112_v27  ;;  %v1109_v27 = vld [vmem:[#allocation8 + $0xe8] sm:$0xff]  ;;  %v1140_v28 = vld [vmem:[#allocation8 + $0x1e0] sm:$0xff] }
 0x111   :  { %1757 = vmatpush1.bf16.msra.mxu1 %v1756_v36  ;;  %1563 = vmatprep.subr.bf16.mxu0 %v1562_v37  ;;  %v1778_v36 = vpack.c.bf16 %v1099_v30, %v1098_v29  ;;  %v1082_v37 = vld [vmem:[#allocation8 + $0x10] sm:$0xff]  ;;  %v1141_v29 = vld [vmem:[#allocation8 + $0x1e8] sm:$0xff]  ;;  %v1798_v32 = vpack.c.bf16 %v1109_v27, %v1108_v26 }
 0x112   :  { %1759 = vmatprep.subr.bf16.mxu1 %v1758_v41  ;;  %v1115_v41 = vld [vmem:[#allocation8 + $0x118] sm:$0xff]  ;;  %v1780_v46 = vpack.c.bf16 %v1083_v38, %v1082_v37  ;;  %v1125_v38 = vld [vmem:[#allocation8 + $0x168] sm:$0xff] }
 0x114   :  { %1565 = vmatpush1.bf16.msra.mxu0 %v1564_v47  ;;  %v1812_v47 = vpack.c.bf16 %v1115_v41, %v1114_v39  ;;  %v1111_v41 = vld [vmem:[#allocation8 + $0xf8] sm:$0xff] }
 0x115   :  { %1761 = vmatpush1.bf16.msra.mxu1 %v1760_v48  ;;  %1567 = vmatprep.subr.bf16.mxu0 %v1566_v49  ;;  %v1782_v48 = vpack.c.bf16 %v1101_v43, %v1100_v42  ;;  %v1084_v49 = vld [vmem:[#allocation8 + $0x20] sm:$0xff]  ;;  %v1142_v42 = vld [vmem:[#allocation8 + $0x1f0] sm:$0xff] }
 0x116   :  { %1763 = vmatprep.subr.bf16.mxu1 %v1762_v53  ;;  %v1117_v53 = vld [vmem:[#allocation8 + $0x128] sm:$0xff]  ;;  %v1784_v58 = vpack.c.bf16 %v1085_v50, %v1084_v49  ;;  %v1126_v49 = vld [vmem:[#allocation8 + $0x170] sm:$0xff]  ;;  %v1127_v50 = vld [vmem:[#allocation8 + $0x178] sm:$0xff] }
 0x118   :  { %1569 = vmatpush1.bf16.msra.mxu0 %v1568_v59  ;;  %v1816_v59 = vpack.c.bf16 %v1117_v53, %v1116_v51  ;;  %v1836_v51 = vpack.c.bf16 %v1127_v50, %v1126_v49 }
 0x119   :  { %1765 = vmatpush1.bf16.msra.mxu1 %v1764_v60  ;;  %1571 = vmatprep.subr.bf16.mxu0 %v1570_v61  ;;  %v1786_v60 = vpack.c.bf16 %v1103_v55, %v1102_v54  ;;  %v1086_v61 = vld [vmem:[#allocation8 + $0x30] sm:$0xff]  ;;  %v482_v55 = vld [vmem:[#allocation7] sm:$0xf] }
 0x11a   :  { %1767 = vmatprep.subr.bf16.mxu1 %v1766_v1  ;;  %v1119_v1 = vld [vmem:[#allocation8 + $0x138] sm:$0xff]  ;;  %v1788_v6 = vpack.c.bf16 %v1087_v62, %v1086_v61 }
 0x11c   :  { %1573 = vmatpush1.bf16.msra.mxu0 %v1572_v7  ;;  %v1820_v7 = vpack.c.bf16 %v1119_v1, %v1118_v63 }
 0x11d   :  { %1769 = vmatpush1.bf16.msra.mxu1 %v1768_v8  ;;  %1575 = vmatprep.subr.bf16.mxu0 %v1574_v9  ;;  %v1790_v8 = vpack.c.bf16 %v1105_v3, %v1104_v2  ;;  %v1088_v9 = vld [vmem:[#allocation8 + $0x40] sm:$0xff] }
 0x11e   :  { %1771 = vmatprep.subr.bf16.mxu1 %v1770_v12  ;;  %v1822_v12 = vpack.c.bf16 %v1137_v5, %v1136_v4 }
 0x11f   :  { %715 = vmatmul.mubr.f32.vlgmr.msra.gmra.mrb[0].mxu0 %v87_v17 }
 0x120   :  { %999 = vmatmul.mubr.f32.vlgmr.msra.gmra.mrb[0].mxu1 %v87_v17  ;;  %1577 = vmatpush1.bf16.msra.mxu0 %v1576_v18  ;;  %v1139_v17 = vld [vmem:[#allocation8 + $0x1d8] sm:$0xff]  ;;  %v1792_v18 = vpack.c.bf16 %v1089_v10, %v1088_v9 }
 0x121   :  { %1773 = vmatpush1.bf16.msra.mxu1 %v1772_v21  ;;  %785 = vmatprep.mubr.f32.mxu0 %v2014_v24  ;;  %v1090_v21 = vld [vmem:[#allocation8 + $0x50] sm:$0xff] }
 0x122   :  { %1069 = vmatprep.mubr.f32.mxu1 %v2014_v24  ;;  %1775 = vmatprep.subr.bf16.mxu0 %v1774_v22  ;;  %v1091_v22 = vld [vmem:[#allocation8 + $0x58] sm:$0xff]  ;;  %v1826_v24 = vpack.c.bf16 %v1139_v17, %v1138_v16 }
 0x123   :  { %1807 = vmatprep.subr.bf16.mxu1 %v1806_v23  ;;  %v1122_v23 = vld [vmem:[#allocation8 + $0x150] sm:$0xff]  ;;  %v1796_v30 = vpack.c.bf16 %v1091_v22, %v1090_v21 }
 0x124   :  { %v1828_v31 = vpack.c.bf16 %v1123_v25, %v1122_v23 }
 0x127   :  { %1309 = vmatmul.mubr.msk.f32.vlgmr.msra.gmra.mrb[0].mxu0 %vm504_vm0, %v89_v33 }
 0x128   :  { %1310 = vmatmul.mubr.msk.f32.vlgmr.msra.gmra.mrb[0].mxu1 %vm504_vm0, %v89_v33  ;;  %1777 = vmatpush3.bf16.msra.mxu0 %v1776_v34  ;;  %v1830_v33 = vpack.c.bf16 %v1141_v29, %v1140_v28  ;;  %v1092_v34 = vld [vmem:[#allocation8 + $0x60] sm:$0xff] }
 0x129   :  { %1809 = vmatpush3.bf16.msra.mxu1 %v1808_v35  ;;  %1779 = vmatprep.subr.bf16.mxu0 %v1778_v36  ;;  %v1093_v35 = vld [vmem:[#allocation8 + $0x68] sm:$0xff]  ;;  %v1124_v36 = vld [vmem:[#allocation8 + $0x160] sm:$0xff] }
 0x12a   :  { %1811 = vmatprep.subr.bf16.mxu1 %v1810_v40  ;;  %v1800_v37 = vpack.c.bf16 %v1093_v35, %v1092_v34  ;;  %v1832_v39 = vpack.c.bf16 %v1125_v38, %v1124_v36  ;;  %v1110_v40 = vld [vmem:[#allocation8 + $0xf0] sm:$0xff] }
 0x12b   :  { %v1802_v43 = vpack.c.bf16 %v1111_v41, %v1110_v40 }
 0x12c   :  { %1781 = vmatpush3.bf16.msra.mxu0 %v1780_v46  ;;  %v1095_v46 = vld [vmem:[#allocation8 + $0x78] sm:$0xff] }
 0x12d   :  { %1813 = vmatpush3.bf16.msra.mxu1 %v1812_v47  ;;  %1783 = vmatprep.subr.bf16.mxu0 %v1782_v48  ;;  %v1834_v47 = vpack.c.bf16 %v1143_v44, %v1142_v42  ;;  %v1804_v48 = vpack.c.bf16 %v1095_v46, %v1094_v45 }
 0x12e   :  { %1815 = vmatprep.subr.bf16.mxu1 %v1814_v52  ;;  %v484_v52 = vlaneseq }
 0x130   :  { %1785 = vmatpush3.bf16.msra.mxu0 %v1784_v58  ;;  %v485_v53 = vshrl.u32 %v484_v52, 7 }
 0x131   :  { %1817 = vmatpush3.bf16.msra.mxu1 %v1816_v59  ;;  %1787 = vmatprep.subr.bf16.mxu0 %v1786_v60 }
 0x132   :  { %1819 = vmatprep.subr.bf16.mxu1 %v1818_v0  ;;  %v486_v54 = vsub.s32 0, %v485_v53  ;;  %v494_v56 = vsub.s32 2, %v485_v53  ;;  %v490_v57 = vsub.s32 1, %v485_v53  ;;  %v498_v58 = vsub.s32 3, %v485_v53 }
 0x134   :  { %1789 = vmatpush3.bf16.msra.mxu0 %v1788_v6  ;;  %v487_v59 = vrot.slane %v482_v55, %v486_v54  ;;  %v495_v60 = vrot.slane %v482_v55, %v494_v56  ;;  %v491_v61 = vrot.slane %v482_v55, %v490_v57  ;;  %v499_v62 = vrot.slane %v482_v55, %v498_v58 }
 0x135   :  { %1821 = vmatpush3.bf16.msra.mxu1 %v1820_v7  ;;  %1791 = vmatprep.subr.bf16.mxu0 %v1790_v8 }
 0x136   :  { %1823 = vmatprep.subr.bf16.mxu1 %v1822_v12 }
 0x138   :  { %1793 = vmatpush3.bf16.msra.mxu0 %v1792_v18 }
 0x139   :  { %1825 = vmatpush3.bf16.msra.mxu1 %v1824_v19  ;;  %1795 = vmatprep.subr.bf16.mxu0 %v1794_v20 }
 0x13a   :  { %1827 = vmatprep.subr.bf16.mxu1 %v1826_v24 }
 0x13c   :  { %1797 = vmatpush3.bf16.msra.mxu0 %v1796_v30 }
 0x13d   :  { %1829 = vmatpush3.bf16.msra.mxu1 %v1828_v31  ;;  %1799 = vmatprep.subr.bf16.mxu0 %v1798_v32 }
 0x13e   :  { %1831 = vmatprep.subr.bf16.mxu1 %v1830_v33 }
 0x140   :  { %1801 = vmatpush3.bf16.msra.mxu0 %v1800_v37 }
 0x141   :  { %1833 = vmatpush3.bf16.msra.mxu1 %v1832_v39  ;;  %1803 = vmatprep.subr.bf16.mxu0 %v1802_v43 }
 0x142   :  { %1835 = vmatprep.subr.bf16.mxu1 %v1834_v47 }
 0x144   :  { %1805 = vmatpush3.bf16.msra.mxu0 %v1804_v48 }
 0x145   :  { %1837 = vmatpush3.bf16.msra.mxu1 %v1836_v51 }
 0x1fa   :  { %v787_v63 = vpop.f32.mrb[0].mxu0 }
 0x1fb   :  { %v1838_v0 = vadd.f32 %v787_v63, %v487_v59  ;;  %v1071_v1 = vpop.f32.mrb[0].mxu1  ;;  %v789_v2 = vpop.f32.mrb[1].mxu0 }
 0x1fc   :  { %v1840_v3 = vadd.f32 %v1071_v1, %v495_v60  ;;  %v1839_v4 = vadd.f32 %v789_v2, %v491_v61  ;;  %v1073_v5 = vpop.f32.mrb[1].mxu1 }
 0x1fd   :  { %v1841_v6 = vadd.f32 %v1073_v5, %v499_v62  ;;  %v1076_v8 = vmax.f32 %v1838_v0, 0.0 }
 0x1fe   :  { %v1077_v7 = vmax.f32 %v1839_v4, 0.0  ;;  %v1078_v10 = vmax.f32 %v1840_v3, 0.0 }
 0x1ff   :  { %v1079_v9 = vmax.f32 %v1841_v6, 0.0 }
 0x200   :  { %1215 = vmatprep.mubr.f32.mxu0 %v1077_v7 }
 0x201   :  { %1285 = vmatprep.mubr.f32.mxu1 %v1079_v9  ;;  %1216 = vmatmul.mubr.f32.vlgmr.msra.gmra.mrb[2].mxu0 %v1076_v8 }
 0x202   :  { %1286 = vmatmul.mubr.f32.vlgmr.msra.gmra.mrb[2].mxu1 %v1078_v10 }
 0x2d4   :  { %v1344_v11 = vpop.f32.mrb[2].mxu0 }
 0x2d5   :  { %v1379_v12 = vpop.f32.mrb[2].mxu1  ;;  %v1345_v14 = vpop.f32.mrb[3].mxu0 }
 0x2d6   :  { %v1346_v15 = vadd.f32 %v1345_v14, %v1344_v11  ;;  %v1380_v16 = vpop.f32.mrb[3].mxu1 }
 0x2d7   :  { %v1381_v17 = vadd.f32 %v1380_v16, %v1379_v12 }
 0x2d8   :  { %v1218_v18 = vadd.f32 %v1346_v15, %v1311_v13 }
 0x2da   :  { %v1288_v19 = vadd.f32 %v1381_v17, %v1218_v18 }
 0x2dc   :  { %1291 = vst [vmem:[#allocation11] sm:$0xff] %v1288_v19 }
 0x2dd   :  { %1986 = shalt.err (!%p1983_p2)
}
 0x2de   :  { %s1987_s6 = scalar_lea.hbm %s2123_s5, 128 }
 0x2df   :  { %p1988_p3 = scmp.ne.s32.totalorder %s2123_s5, %s1987_s6  ;;  %p1991_p4 = scmp.lt.u32.totalorder %s1987_s6, %s2123_s5 }
 0x2e1   :  { %p1993_p5 = pnand %p1991_p4, %p1988_p3 }
 0x2e3   :  { %1996 = shalt.err (!%p1993_p5)
}
 0x2e4   :  { %1301 = dma.vmem_to_hbm [thread:$0]  %s1299_s28, 128, %s2123_s5, [#allocation4]  }
 0x2e5   :  { %2003 = dma.done.wait [#allocation4], 128  }
 0x2e6   :  { %2004 = vsyncadd [#allocation4], 4294967168 }
 0x2e7   :  { %1305 = vsyncpa [#allocation3], 1 }
 0x2e8   :  { %1306 = vsyncpa [#allocation6], 1 }
 0x2e9   :  { %1307 = vsyncpa [#allocation9], 1 }
 0x2ea   :  { %1308 = vsyncpa [#allocation4], 1 }

</bundles_post_ra>
